<compile_context>
chip_gen: v6e
topology: v6e:2x2x1
jax: 0.10.0
libtpu: 0.0.40
codegen_flags: <defaults>
</compile_context>

<pallas_src>
import functools
import math

import jax
import jax.numpy as jnp
from jax.experimental import pallas as pl
from jax.experimental.pallas import tpu as pltpu

NEG_INF = -1e30  # stands in for float('-inf') used by masked_fill / non-top-k entries


def mtm_kernel(q_ref, k_ref, v_ref, mask_ref,
               wq_ref, bq_ref, wk_ref, bk_ref, wv_ref, bv_ref, wo_ref, bo_ref,
               o_ref, *, num_heads, topk, scale):
    f32, bf16 = jnp.float32, jnp.bfloat16

    q_in = q_ref[0]      # (Sq, D) f32
    k_in = k_ref[0]      # (Sk, D) f32
    v_in = v_ref[0]      # (Sk, D) f32
    mask = mask_ref[0]   # (1, Sk) f32: 1.0 keep / 0.0 masked (broadcast over heads+queries)

    Sq, D = q_in.shape
    Sk = k_in.shape[0]
    dk = D // num_heads

    # ---- the four linear projections: bf16 operands, f32 MXU accumulation ----
    q = jnp.dot(q_in.astype(bf16), wq_ref[...], preferred_element_type=f32) + bq_ref[...]
    k = jnp.dot(k_in.astype(bf16), wk_ref[...], preferred_element_type=f32) + bk_ref[...]
    v = jnp.dot(v_in.astype(bf16), wv_ref[...], preferred_element_type=f32) + bv_ref[...]

    # ---- split heads -> (H, S, dk) and run batched-head MXU einsums ----
    qh = jnp.stack([q[:, h * dk:(h + 1) * dk] for h in range(num_heads)], axis=0).astype(bf16)
    kh = jnp.stack([k[:, h * dk:(h + 1) * dk] for h in range(num_heads)], axis=0).astype(bf16)
    vh = jnp.stack([v[:, h * dk:(h + 1) * dk] for h in range(num_heads)], axis=0).astype(bf16)

    scores = jnp.einsum('hqd,hkd->hqk', qh, kh,
                        preferred_element_type=f32) * scale              # (H, Sq, Sk) f32

    # key-padding mask, hoisted into a single additive bias
    bias = jnp.where(mask == 0.0, NEG_INF, 0.0)                          # (1, Sk)
    scores = scores + bias[None, :, :]

    # ---- top-k selection (== torch.topk + gather, dense formulation) ----
    # After (topk-1) rounds of removing the current row max, the remaining row max is
    # the k-th largest score; keep everything >= it, drop the rest.
    def _remove_row_max(_, work):
        cur = jnp.max(work, axis=-1, keepdims=True)
        return jnp.where(work >= cur, NEG_INF, work)

    work = jax.lax.fori_loop(0, topk - 1, _remove_row_max, scores)
    thr = jnp.max(work, axis=-1, keepdims=True)                          # k-th largest, (H, Sq, 1)
    sel = jnp.where(scores >= thr, scores, NEG_INF)                      # (H, Sq, Sk)

    # ---- softmax over selected scores (dropped entries underflow to exactly 0) ----
    m = jnp.max(sel, axis=-1, keepdims=True)
    p = jnp.exp(sel - m)
    denom = jnp.sum(p, axis=-1, keepdims=True)
    p = p * pl.reciprocal(denom, approx=True)                            # EUP slot, ~free

    # ---- weighted value sum, merge heads, output projection ----
    ctx = jnp.einsum('hqk,hkd->hqd', p.astype(bf16), vh,
                     preferred_element_type=f32)                         # (H, Sq, dk)
    ctx = jnp.concatenate([ctx[h] for h in range(num_heads)], axis=-1)   # (Sq, D)

    out = jnp.dot(ctx.astype(bf16), wo_ref[...], preferred_element_type=f32) + bo_ref[...]
    o_ref[0] = out.astype(o_ref.dtype)


def multi_thread_memory_forward(query, key, value, mask, params, *, num_heads, topk):
    B, Sq, D = query.shape
    Sk = key.shape[1]
    assert D % num_heads == 0
    assert 1 <= topk <= Sk
    if mask is None:
        mask = jnp.ones((B, 1, Sk), jnp.float32)

    scale = 1.0 / math.sqrt(D // num_heads)
    kernel = functools.partial(mtm_kernel, num_heads=num_heads, topk=topk, scale=scale)

    weight_keys = ("wq", "bq", "wk", "bk", "wv", "bv", "wo", "bo")
    weights = [params[k] for k in weight_keys]

    in_specs = [
        pl.BlockSpec((1, Sq, D), lambda b: (b, 0, 0)),   # query: one batch row per grid step
        pl.BlockSpec((1, Sk, D), lambda b: (b, 0, 0)),   # key   (memory slots)
        pl.BlockSpec((1, Sk, D), lambda b: (b, 0, 0)),   # value (memory slots)
        pl.BlockSpec((1, 1, Sk), lambda b: (b, 0, 0)),   # key-padding mask
    ]
    for w in weights:  # small (D,D)/(1,D) weights, fully VMEM-resident, constant index
        in_specs.append(pl.BlockSpec(w.shape, lambda b: (0, 0)))

    return pl.pallas_call(
        kernel,
        out_shape=jax.ShapeDtypeStruct((B, Sq, D), jnp.float32),
        grid_spec=pltpu.PrefetchScalarGridSpec(
            num_scalar_prefetch=0,
            grid=(B,),
            in_specs=in_specs,
            out_specs=pl.BlockSpec((1, Sq, D), lambda b: (b, 0, 0)),
        ),
        compiler_params=pltpu.CompilerParams(
            dimension_semantics=("parallel",),
            vmem_limit_bytes=32 * 1024 * 1024,
        ),
    )(query, key, value, mask, *weights)


# ------------------- pure-JAX reference (mirrors the torch code path) -------------------
def multi_thread_memory_reference(query, key, value, mask, params, *, num_heads, topk):
    # topk -> gather -> softmax -> weighted sum, exactly like memory_querying_responding.
    # Matmul operands are cast to bf16 (f32 accumulation) to match the kernel's MXU
    # precision so the top-k selection is comparable.
    f32, bf16 = jnp.float32, jnp.bfloat16
    B, Sq, D = query.shape
    Sk = key.shape[1]
    dk = D // num_heads
    scale = 1.0 / math.sqrt(dk)

    def lin(x, w, b):
        return jnp.dot(x.astype(bf16), w.astype(bf16), preferred_element_type=f32) + b

    q = lin(query, params["wq"], params["bq"])
    k = lin(key, params["wk"], params["bk"])
    v = lin(value, params["wv"], params["bv"])

    qh = q.reshape(B, Sq, num_heads, dk).transpose(0, 2, 1, 3)
    kh = k.reshape(B, Sk, num_heads, dk).transpose(0, 2, 1, 3)
    vh = v.reshape(B, Sk, num_heads, dk).transpose(0, 2, 1, 3)

    scores = jnp.einsum('bhqd,bhkd->bhqk', qh.astype(bf16), kh.astype(bf16),
                        preferred_element_type=f32) * scale
    if mask is not None:
        scores = jnp.where(mask[:, None, :, :] == 0.0, NEG_INF, scores)

    sel_scores, idx = jax.lax.top_k(scores, topk)                        # (B,H,Sq,topk)
    p = jax.nn.softmax(sel_scores, axis=-1)
    dummy_value = jnp.broadcast_to(vh[:, :, None, :, :], (B, num_heads, Sq, Sk, dk))
    dummy_idx = jnp.broadcast_to(idx[..., None], (B, num_heads, Sq, topk, dk))
    sel_v = jnp.take_along_axis(dummy_value, dummy_idx, axis=3)          # (B,H,Sq,topk,dk)
    ctx = jnp.einsum('bhqt,bhqtd->bhqd', p.astype(bf16), sel_v.astype(bf16),
                     preferred_element_type=f32)
    ctx = ctx.transpose(0, 2, 1, 3).reshape(B, Sq, D)
    return lin(ctx, params["wo"], params["bo"])


def init_params(key, d_model):
    ks = jax.random.split(key, 8)
    s = 0.1

    def w(k, shape, dtype):
        return (jax.random.normal(k, shape, jnp.float32) * s).astype(dtype)

    return {
        "wq": w(ks[0], (d_model, d_model), jnp.bfloat16),
        "bq": w(ks[1], (1, d_model), jnp.float32),
        "wk": w(ks[2], (d_model, d_model), jnp.bfloat16),
        "bk": w(ks[3], (1, d_model), jnp.float32),
        "wv": w(ks[4], (d_model, d_model), jnp.bfloat16),
        "bv": w(ks[5], (1, d_model), jnp.float32),
        "wo": w(ks[6], (d_model, d_model), jnp.bfloat16),
        "bo": w(ks[7], (1, d_model), jnp.float32),
    }


if __name__ == "__main__":
    # small but TPU-friendly shapes: 2 heads of d_k=128 (lane-dense), 128 memory slots,
    # 8 query tokens, default topk=32 (< Sk so the selection path is exercised)
    B, SQ, SK, D, H, TOPK = 2, 8, 128, 256, 2, 32

    root = jax.random.PRNGKey(0)
    kq, km, kp = jax.random.split(root, 3)
    query = jax.random.normal(kq, (B, SQ, D), jnp.float32)
    memory = jax.random.normal(km, (1, SK, D), jnp.float32)
    key_in = jnp.broadcast_to(memory, (B, SK, D))    # base_cmn passes the memory matrix
    value_in = key_in                                # as both key and value

    # key-padding mask over memory slots: batch 1 has its last 5 slots masked out
    mask = jnp.ones((B, 1, SK), jnp.float32)
    mask = mask.at[1, 0, SK - 5:].set(0.0)

    params = init_params(kp, D)

    out = multi_thread_memory_forward(query, key_in, value_in, mask, params,
                                      num_heads=H, topk=TOPK)
    out = jax.block_until_ready(out)

    ref = multi_thread_memory_reference(query, key_in, value_in, mask, params,
                                        num_heads=H, topk=TOPK)
    assert out.shape == (B, SQ, D)
    max_err = jnp.max(jnp.abs(out - ref))
    assert jnp.allclose(out, ref, atol=3e-2, rtol=3e-2), f"mismatch vs reference: {max_err}"

    print("KERNEL_OK")
</pallas_src>

<mosaic_0001>
module attributes {stable_mosaic.version = 11 : i64} {
  func.func @mtm_kernel(%arg0: i32, %arg1: memref<1x8x256xf32, #tpu.memory_space<vmem>>, %arg2: memref<1x128x256xf32, #tpu.memory_space<vmem>>, %arg3: memref<1x128x256xf32, #tpu.memory_space<vmem>>, %arg4: memref<1x1x128xf32, #tpu.memory_space<vmem>>, %arg5: memref<256x256xbf16, #tpu.memory_space<vmem>>, %arg6: memref<1x256xf32, #tpu.memory_space<vmem>>, %arg7: memref<256x256xbf16, #tpu.memory_space<vmem>>, %arg8: memref<1x256xf32, #tpu.memory_space<vmem>>, %arg9: memref<256x256xbf16, #tpu.memory_space<vmem>>, %arg10: memref<1x256xf32, #tpu.memory_space<vmem>>, %arg11: memref<256x256xbf16, #tpu.memory_space<vmem>>, %arg12: memref<1x256xf32, #tpu.memory_space<vmem>>, %arg13: memref<1x8x256xf32, #tpu.memory_space<vmem>>) attributes {dimension_semantics = [#tpu.dimension_semantics<parallel>], iteration_bounds = array<i64: 2>, scalar_prefetch = 0 : i64, scratch_operands = 0 : i64, tpu.core_type = #tpu.core_type<tc>, window_params = [{transform_indices = @transform_0, window_bounds = array<i64: 1, 8, 256>}, {transform_indices = @transform_1, window_bounds = array<i64: 1, 128, 256>}, {transform_indices = @transform_2, window_bounds = array<i64: 1, 128, 256>}, {transform_indices = @transform_3, window_bounds = array<i64: 1, 1, 128>}, {pipeline_mode = #tpu.pipeline_mode<synchronous>, transform_indices = @transform_4, window_bounds = array<i64: 256, 256>}, {pipeline_mode = #tpu.pipeline_mode<synchronous>, transform_indices = @transform_5, window_bounds = array<i64: 1, 256>}, {pipeline_mode = #tpu.pipeline_mode<synchronous>, transform_indices = @transform_6, window_bounds = array<i64: 256, 256>}, {pipeline_mode = #tpu.pipeline_mode<synchronous>, transform_indices = @transform_7, window_bounds = array<i64: 1, 256>}, {pipeline_mode = #tpu.pipeline_mode<synchronous>, transform_indices = @transform_8, window_bounds = array<i64: 256, 256>}, {pipeline_mode = #tpu.pipeline_mode<synchronous>, transform_indices = @transform_9, window_bounds = array<i64: 1, 256>}, {pipeline_mode = #tpu.pipeline_mode<synchronous>, transform_indices = @transform_10, window_bounds = array<i64: 256, 256>}, {pipeline_mode = #tpu.pipeline_mode<synchronous>, transform_indices = @transform_11, window_bounds = array<i64: 1, 256>}, {transform_indices = @transform_12, window_bounds = array<i64: 1, 8, 256>}]} {
    %c0 = arith.constant 0 : index
    %c0_0 = arith.constant 0 : index
    %c0_1 = arith.constant 0 : index
    %0 = vector.load %arg1[%c0, %c0_0, %c0_1] : memref<1x8x256xf32, #tpu.memory_space<vmem>>, vector<1x8x256xf32>
    %1 = vector.shape_cast %0 : vector<1x8x256xf32> to vector<8x256xf32>
    %c0_2 = arith.constant 0 : index
    %c0_3 = arith.constant 0 : index
    %c0_4 = arith.constant 0 : index
    %2 = vector.load %arg2[%c0_2, %c0_3, %c0_4] : memref<1x128x256xf32, #tpu.memory_space<vmem>>, vector<1x128x256xf32>
    %3 = vector.shape_cast %2 : vector<1x128x256xf32> to vector<128x256xf32>
    %c0_5 = arith.constant 0 : index
    %c0_6 = arith.constant 0 : index
    %c0_7 = arith.constant 0 : index
    %4 = vector.load %arg3[%c0_5, %c0_6, %c0_7] : memref<1x128x256xf32, #tpu.memory_space<vmem>>, vector<1x128x256xf32>
    %5 = vector.shape_cast %4 : vector<1x128x256xf32> to vector<128x256xf32>
    %c0_8 = arith.constant 0 : index
    %c0_9 = arith.constant 0 : index
    %c0_10 = arith.constant 0 : index
    %6 = vector.load %arg4[%c0_8, %c0_9, %c0_10] : memref<1x1x128xf32, #tpu.memory_space<vmem>>, vector<1x1x128xf32>
    %7 = vector.shape_cast %6 : vector<1x1x128xf32> to vector<1x128xf32>
    %8 = arith.truncf %1 : vector<8x256xf32> to vector<8x256xbf16>
    %c0_11 = arith.constant 0 : index
    %c0_12 = arith.constant 0 : index
    %9 = vector.load %arg5[%c0_11, %c0_12] : memref<256x256xbf16, #tpu.memory_space<vmem>>, vector<256x256xbf16>
    %cst = arith.constant dense<0.000000e+00> : vector<8x256xf32>
    %10 = tpu.matmul %8, %9, %cst {dimension_numbers = #tpu.dot_dimension_numbers<[1], [0], [0], [1], [0, 0, 1, 1], [], []>} : vector<8x256xbf16>, vector<256x256xbf16>, vector<8x256xf32> -> vector<8x256xf32>
    %c0_13 = arith.constant 0 : index
    %c0_14 = arith.constant 0 : index
    %11 = vector.load %arg6[%c0_13, %c0_14] : memref<1x256xf32, #tpu.memory_space<vmem>>, vector<1x256xf32>
    %12 = vector.broadcast %11 : vector<1x256xf32> to vector<8x256xf32>
    %13 = arith.addf %10, %12 : vector<8x256xf32>
    %14 = arith.truncf %3 : vector<128x256xf32> to vector<128x256xbf16>
    %c0_15 = arith.constant 0 : index
    %c0_16 = arith.constant 0 : index
    %15 = vector.load %arg7[%c0_15, %c0_16] : memref<256x256xbf16, #tpu.memory_space<vmem>>, vector<256x256xbf16>
    %cst_17 = arith.constant dense<0.000000e+00> : vector<128x256xf32>
    %16 = tpu.matmul %14, %15, %cst_17 {dimension_numbers = #tpu.dot_dimension_numbers<[1], [0], [0], [1], [0, 0, 1, 1], [], []>} : vector<128x256xbf16>, vector<256x256xbf16>, vector<128x256xf32> -> vector<128x256xf32>
    %c0_18 = arith.constant 0 : index
    %c0_19 = arith.constant 0 : index
    %17 = vector.load %arg8[%c0_18, %c0_19] : memref<1x256xf32, #tpu.memory_space<vmem>>, vector<1x256xf32>
    %18 = vector.broadcast %17 : vector<1x256xf32> to vector<128x256xf32>
    %19 = arith.addf %16, %18 : vector<128x256xf32>
    %20 = arith.truncf %5 : vector<128x256xf32> to vector<128x256xbf16>
    %c0_20 = arith.constant 0 : index
    %c0_21 = arith.constant 0 : index
    %21 = vector.load %arg9[%c0_20, %c0_21] : memref<256x256xbf16, #tpu.memory_space<vmem>>, vector<256x256xbf16>
    %cst_22 = arith.constant dense<0.000000e+00> : vector<128x256xf32>
    %22 = tpu.matmul %20, %21, %cst_22 {dimension_numbers = #tpu.dot_dimension_numbers<[1], [0], [0], [1], [0, 0, 1, 1], [], []>} : vector<128x256xbf16>, vector<256x256xbf16>, vector<128x256xf32> -> vector<128x256xf32>
    %c0_23 = arith.constant 0 : index
    %c0_24 = arith.constant 0 : index
    %23 = vector.load %arg10[%c0_23, %c0_24] : memref<1x256xf32, #tpu.memory_space<vmem>>, vector<1x256xf32>
    %24 = vector.broadcast %23 : vector<1x256xf32> to vector<128x256xf32>
    %25 = arith.addf %22, %24 : vector<128x256xf32>
    %26 = vector.extract_strided_slice %13 {offsets = [0, 0], sizes = [8, 128], strides = [1, 1]} : vector<8x256xf32> to vector<8x128xf32>
    %27 = vector.extract_strided_slice %13 {offsets = [0, 128], sizes = [8, 128], strides = [1, 1]} : vector<8x256xf32> to vector<8x128xf32>
    %28 = vector.shape_cast %26 : vector<8x128xf32> to vector<1x8x128xf32>
    %29 = vector.shape_cast %27 : vector<8x128xf32> to vector<1x8x128xf32>
    %30 = tpu.concatenate %28, %29 in 0 : vector<1x8x128xf32>, vector<1x8x128xf32> -> vector<2x8x128xf32>
    %31 = arith.truncf %30 : vector<2x8x128xf32> to vector<2x8x128xbf16>
    %32 = vector.extract_strided_slice %19 {offsets = [0, 0], sizes = [128, 128], strides = [1, 1]} : vector<128x256xf32> to vector<128x128xf32>
    %33 = vector.extract_strided_slice %19 {offsets = [0, 128], sizes = [128, 128], strides = [1, 1]} : vector<128x256xf32> to vector<128x128xf32>
    %34 = vector.shape_cast %32 : vector<128x128xf32> to vector<1x128x128xf32>
    %35 = vector.shape_cast %33 : vector<128x128xf32> to vector<1x128x128xf32>
    %36 = tpu.concatenate %34, %35 in 0 : vector<1x128x128xf32>, vector<1x128x128xf32> -> vector<2x128x128xf32>
    %37 = arith.truncf %36 : vector<2x128x128xf32> to vector<2x128x128xbf16>
    %38 = vector.extract_strided_slice %25 {offsets = [0, 0], sizes = [128, 128], strides = [1, 1]} : vector<128x256xf32> to vector<128x128xf32>
    %39 = vector.extract_strided_slice %25 {offsets = [0, 128], sizes = [128, 128], strides = [1, 1]} : vector<128x256xf32> to vector<128x128xf32>
    %40 = vector.shape_cast %38 : vector<128x128xf32> to vector<1x128x128xf32>
    %41 = vector.shape_cast %39 : vector<128x128xf32> to vector<1x128x128xf32>
    %42 = tpu.concatenate %40, %41 in 0 : vector<1x128x128xf32>, vector<1x128x128xf32> -> vector<2x128x128xf32>
    %43 = arith.truncf %42 : vector<2x128x128xf32> to vector<2x128x128xbf16>
    "tpu.trace_start"() <{level = 10 : i32, message = "hqd,hkd->hqk"}> : () -> ()
    %cst_25 = arith.constant dense<0.000000e+00> : vector<2x8x128xf32>
    %44 = tpu.matmul %31, %37, %cst_25 {dimension_numbers = #tpu.dot_dimension_numbers<[2], [2], [1], [1], [0, 0, 0, 1, 1, 1], [0], [0]>} : vector<2x8x128xbf16>, vector<2x128x128xbf16>, vector<2x8x128xf32> -> vector<2x8x128xf32>
    "tpu.trace_stop"() : () -> ()
    %cst_26 = arith.constant 0.0883883461 : f32
    %45 = vector.broadcast %cst_26 : f32 to vector<2x8x128xf32>
    %46 = arith.mulf %44, %45 : vector<2x8x128xf32>
    %cst_27 = arith.constant 0.000000e+00 : f32
    %47 = vector.broadcast %cst_27 : f32 to vector<1x128xf32>
    %48 = arith.cmpf oeq, %7, %47 : vector<1x128xf32>
    %cst_28 = arith.constant -1.000000e+30 : f32
    %cst_29 = arith.constant 0.000000e+00 : f32
    %49 = vector.broadcast %cst_28 : f32 to vector<1x128xf32>
    %50 = vector.broadcast %cst_29 : f32 to vector<1x128xf32>
    %51 = arith.select %48, %49, %50 : vector<1x128xi1>, vector<1x128xf32>
    %52 = vector.shape_cast %51 : vector<1x128xf32> to vector<1x1x128xf32>
    %53 = vector.broadcast %52 : vector<1x1x128xf32> to vector<2x8x128xf32>
    %54 = arith.addf %46, %53 : vector<2x8x128xf32>
    %c0_i32 = arith.constant 0 : i32
    %c31_i32 = arith.constant 31 : i32
    %55 = arith.addi %c0_i32, %c31_i32 : i32
    %c1_i32 = arith.constant 1 : i32
    %56 = scf.for %arg14 = %c0_i32 to %55 step %c1_i32 iter_args(%arg15 = %54) -> (vector<2x8x128xf32>)  : i32 {
      %cst_43 = arith.constant dense<0xFF800000> : vector<2x8xf32>
      %89 = vector.multi_reduction <maximumf>, %arg15, %cst_43 [2] : vector<2x8x128xf32> to vector<2x8xf32>
      %90 = vector.shape_cast %89 : vector<2x8xf32> to vector<2x8x1xf32>
      %91 = vector.broadcast %90 : vector<2x8x1xf32> to vector<2x8x128xf32>
      %92 = arith.cmpf oge, %arg15, %91 : vector<2x8x128xf32>
      %cst_44 = arith.constant -1.000000e+30 : f32
      %93 = vector.broadcast %cst_44 : f32 to vector<2x8x128xf32>
      %94 = arith.select %92, %93, %arg15 : vector<2x8x128xi1>, vector<2x8x128xf32>
      scf.yield %94 : vector<2x8x128xf32>
    }
    %cst_30 = arith.constant dense<0xFF800000> : vector<2x8xf32>
    %57 = vector.multi_reduction <maximumf>, %56, %cst_30 [2] : vector<2x8x128xf32> to vector<2x8xf32>
    %58 = vector.shape_cast %57 : vector<2x8xf32> to vector<2x8x1xf32>
    %59 = vector.broadcast %58 : vector<2x8x1xf32> to vector<2x8x128xf32>
    %60 = arith.cmpf oge, %54, %59 : vector<2x8x128xf32>
    %cst_31 = arith.constant -1.000000e+30 : f32
    %61 = vector.broadcast %cst_31 : f32 to vector<2x8x128xf32>
    %62 = arith.select %60, %54, %61 : vector<2x8x128xi1>, vector<2x8x128xf32>
    %cst_32 = arith.constant dense<0xFF800000> : vector<2x8xf32>
    %63 = vector.multi_reduction <maximumf>, %62, %cst_32 [2] : vector<2x8x128xf32> to vector<2x8xf32>
    %64 = vector.shape_cast %63 : vector<2x8xf32> to vector<2x8x1xf32>
    %65 = vector.broadcast %64 : vector<2x8x1xf32> to vector<2x8x128xf32>
    %66 = arith.subf %62, %65 : vector<2x8x128xf32>
    %67 = math.exp %66 : vector<2x8x128xf32>
    %cst_33 = arith.constant dense<0.000000e+00> : vector<2x8xf32>
    %68 = vector.multi_reduction <add>, %67, %cst_33 [2] : vector<2x8x128xf32> to vector<2x8xf32>
    %69 = vector.shape_cast %68 : vector<2x8xf32> to vector<2x8x1xf32>
    %70 = tpu.reciprocal %69 {approx = true} : vector<2x8x1xf32> -> vector<2x8x1xf32>
    %71 = vector.broadcast %70 : vector<2x8x1xf32> to vector<2x8x128xf32>
    %72 = arith.mulf %67, %71 : vector<2x8x128xf32>
    %73 = arith.truncf %72 : vector<2x8x128xf32> to vector<2x8x128xbf16>
    "tpu.trace_start"() <{level = 10 : i32, message = "hqk,hkd->hqd"}> : () -> ()
    %cst_34 = arith.constant dense<0.000000e+00> : vector<2x8x128xf32>
    %74 = tpu.matmul %73, %43, %cst_34 {dimension_numbers = #tpu.dot_dimension_numbers<[2], [1], [1], [2], [0, 0, 0, 1, 1, 2], [0], [0]>} : vector<2x8x128xbf16>, vector<2x128x128xbf16>, vector<2x8x128xf32> -> vector<2x8x128xf32>
    "tpu.trace_stop"() : () -> ()
    %75 = vector.extract_strided_slice %74 {offsets = [0, 0, 0], sizes = [1, 8, 128], strides = [1, 1, 1]} : vector<2x8x128xf32> to vector<1x8x128xf32>
    %76 = vector.shape_cast %75 : vector<1x8x128xf32> to vector<8x128xf32>
    %77 = vector.extract_strided_slice %74 {offsets = [1, 0, 0], sizes = [1, 8, 128], strides = [1, 1, 1]} : vector<2x8x128xf32> to vector<1x8x128xf32>
    %78 = vector.shape_cast %77 : vector<1x8x128xf32> to vector<8x128xf32>
    %79 = tpu.concatenate %76, %78 in 1 : vector<8x128xf32>, vector<8x128xf32> -> vector<8x256xf32>
    %80 = arith.truncf %79 : vector<8x256xf32> to vector<8x256xbf16>
    %c0_35 = arith.constant 0 : index
    %c0_36 = arith.constant 0 : index
    %81 = vector.load %arg11[%c0_35, %c0_36] : memref<256x256xbf16, #tpu.memory_space<vmem>>, vector<256x256xbf16>
    %cst_37 = arith.constant dense<0.000000e+00> : vector<8x256xf32>
    %82 = tpu.matmul %80, %81, %cst_37 {dimension_numbers = #tpu.dot_dimension_numbers<[1], [0], [0], [1], [0, 0, 1, 1], [], []>} : vector<8x256xbf16>, vector<256x256xbf16>, vector<8x256xf32> -> vector<8x256xf32>
    %c0_38 = arith.constant 0 : index
    %c0_39 = arith.constant 0 : index
    %83 = vector.load %arg12[%c0_38, %c0_39] : memref<1x256xf32, #tpu.memory_space<vmem>>, vector<1x256xf32>
    %84 = vector.broadcast %83 : vector<1x256xf32> to vector<8x256xf32>
    %85 = arith.addf %82, %84 : vector<8x256xf32>
    %c0_40 = arith.constant 0 : index
    %c0_41 = arith.constant 0 : index
    %c0_42 = arith.constant 0 : index
    %86 = vector.load %arg13[%c0_40, %c0_41, %c0_42] : memref<1x8x256xf32, #tpu.memory_space<vmem>>, vector<1x8x256xf32>
    %87 = vector.shape_cast %86 : vector<1x8x256xf32> to vector<8x256xf32>
    %88 = vector.shape_cast %85 : vector<8x256xf32> to vector<1x8x256xf32>
    tpu.vector_store %arg13[%c0_40, %c0_41, %c0_42], %88 {strides = array<i32>} : memref<1x8x256xf32, #tpu.memory_space<vmem>>, vector<1x8x256xf32>,
    return
  }
  func.func @transform_0(%arg0: i32) -> (i32, i32, i32) {
    %c0_i32 = arith.constant 0 : i32
    %c0_i32_0 = arith.constant 0 : i32
    %c0_i32_1 = arith.constant 0 : i32
    return %arg0, %c0_i32, %c0_i32_0 : i32, i32, i32
  }
  func.func @transform_1(%arg0: i32) -> (i32, i32, i32) {
    %c0_i32 = arith.constant 0 : i32
    %c0_i32_0 = arith.constant 0 : i32
    %c0_i32_1 = arith.constant 0 : i32
    return %arg0, %c0_i32, %c0_i32_0 : i32, i32, i32
  }
  func.func @transform_2(%arg0: i32) -> (i32, i32, i32) {
    %c0_i32 = arith.constant 0 : i32
    %c0_i32_0 = arith.constant 0 : i32
    %c0_i32_1 = arith.constant 0 : i32
    return %arg0, %c0_i32, %c0_i32_0 : i32, i32, i32
  }
  func.func @transform_3(%arg0: i32) -> (i32, i32, i32) {
    %c0_i32 = arith.constant 0 : i32
    %c0_i32_0 = arith.constant 0 : i32
    %c0_i32_1 = arith.constant 0 : i32
    return %arg0, %c0_i32, %c0_i32_0 : i32, i32, i32
  }
  func.func @transform_4(%arg0: i32) -> (i32, i32) {
    %c0_i32 = arith.constant 0 : i32
    %c0_i32_0 = arith.constant 0 : i32
    %c0_i32_1 = arith.constant 0 : i32
    return %c0_i32, %c0_i32_0 : i32, i32
  }
  func.func @transform_5(%arg0: i32) -> (i32, i32) {
    %c0_i32 = arith.constant 0 : i32
    %c0_i32_0 = arith.constant 0 : i32
    %c0_i32_1 = arith.constant 0 : i32
    return %c0_i32, %c0_i32_0 : i32, i32
  }
  func.func @transform_6(%arg0: i32) -> (i32, i32) {
    %c0_i32 = arith.constant 0 : i32
    %c0_i32_0 = arith.constant 0 : i32
    %c0_i32_1 = arith.constant 0 : i32
    return %c0_i32, %c0_i32_0 : i32, i32
  }
  func.func @transform_7(%arg0: i32) -> (i32, i32) {
    %c0_i32 = arith.constant 0 : i32
    %c0_i32_0 = arith.constant 0 : i32
    %c0_i32_1 = arith.constant 0 : i32
    return %c0_i32, %c0_i32_0 : i32, i32
  }
  func.func @transform_8(%arg0: i32) -> (i32, i32) {
    %c0_i32 = arith.constant 0 : i32
    %c0_i32_0 = arith.constant 0 : i32
    %c0_i32_1 = arith.constant 0 : i32
    return %c0_i32, %c0_i32_0 : i32, i32
  }
  func.func @transform_9(%arg0: i32) -> (i32, i32) {
    %c0_i32 = arith.constant 0 : i32
    %c0_i32_0 = arith.constant 0 : i32
    %c0_i32_1 = arith.constant 0 : i32
    return %c0_i32, %c0_i32_0 : i32, i32
  }
  func.func @transform_10(%arg0: i32) -> (i32, i32) {
    %c0_i32 = arith.constant 0 : i32
    %c0_i32_0 = arith.constant 0 : i32
    %c0_i32_1 = arith.constant 0 : i32
    return %c0_i32, %c0_i32_0 : i32, i32
  }
  func.func @transform_11(%arg0: i32) -> (i32, i32) {
    %c0_i32 = arith.constant 0 : i32
    %c0_i32_0 = arith.constant 0 : i32
    %c0_i32_1 = arith.constant 0 : i32
    return %c0_i32, %c0_i32_0 : i32, i32
  }
  func.func @transform_12(%arg0: i32) -> (i32, i32, i32) {
    %c0_i32 = arith.constant 0 : i32
    %c0_i32_0 = arith.constant 0 : i32
    %c0_i32_1 = arith.constant 0 : i32
    return %arg0, %c0_i32, %c0_i32_0 : i32, i32, i32
  }
}

</mosaic_0001>

<bundles_post_ra>
// kernel: tpu_custom_call.1
= control target key start
LH: loop header
LB: loop body
LE: loop exit
PB: predicated region body
PF: predicated region fallthrough
CT: control target
= control target key end

     0   :  { %s3949_s0 = inlined_call_operand.hbm [shape: f32[2,8,256], index: 0, kind: input, shape index: {}]   ;;  %s3950_s1 = inlined_call_operand.hbm [shape: f32[2,128,256], index: 1, kind: input, shape index: {}]   ;;  %s3951_s2 = inlined_call_operand.hbm [shape: f32[2,128,256], index: 2, kind: input, shape index: {}]   ;;  %s3952_s3 = inlined_call_operand.vmem [shape: f32[2,1,128], index: 3, kind: input, shape index: {}]   ;;  %s3953_s4 = inlined_call_operand.hbm [shape: bf16[256,256], index: 4, kind: input, shape index: {}]   ;;  %s3954_s5 = inlined_call_operand.vmem [shape: f32[1,256], index: 5, kind: input, shape index: {}]   ;;  %s3955_s6 = inlined_call_operand.hbm [shape: bf16[256,256], index: 6, kind: input, shape index: {}]   ;;  %s3956_s7 = inlined_call_operand.vmem [shape: f32[1,256], index: 7, kind: input, shape index: {}]   ;;  %s3957_s8 = inlined_call_operand.hbm [shape: bf16[256,256], index: 8, kind: input, shape index: {}]   ;;  %s3958_s9 = inlined_call_operand.vmem [shape: f32[1,256], index: 9, kind: input, shape index: {}]   ;;  %s3959_s10 = inlined_call_operand.hbm [shape: bf16[256,256], index: 10, kind: input, shape index: {}]   ;;  %s3960_s11 = inlined_call_operand.vmem [shape: f32[1,256], index: 11, kind: input, shape index: {}]   ;;  %s3961_s12 = inlined_call_operand.hbm [shape: f32[2,8,256], index: 12, kind: output, shape index: {}]  }
   0x1   :  { %3985 = sst [smem:[#allocation26_spill]] %s3950_s1 }
   0x2   :  { %3986 = sst [smem:[#allocation27_spill]] %s3952_s3 }
   0x3   :  { %3987 = sst [smem:[#allocation28_spill]] %s3953_s4 }
   0x4   :  { %3988 = sst [smem:[#allocation29_spill]] %s3955_s6 }
   0x5   :  { %3989 = sst [smem:[#allocation30_spill]] %s3957_s8 }
   0x6   :  { %3990 = sst [smem:[#allocation31_spill]] %s3960_s11 }
   0x7   :  { %3991 = sst [smem:[#allocation32_spill]] %s3961_s12 }
   0x8   :  { %17 = vsyncpa [#allocation3], 0 }
   0x9   :  { %19 = vsyncpa [#allocation3 + $0x1], 0 }
   0xa   :  { %20 = vsyncpa [#allocation6], 0 }
   0xb   :  { %22 = vsyncpa [#allocation6 + $0x1], 0 }
   0xc   :  { %23 = vsyncpa [#allocation9], 0 }
   0xd   :  { %24 = vsyncpa [#allocation12], 0 }
   0xe   :  { %25 = vsyncpa [#allocation4], 0 }
   0xf   :  { %27 = vsyncpa [#allocation4 + $0x1], 0  ;;  %s3219_s21 = smov 0   ;;  %s3221_s22 = smov 0  }
  0x10   :  { %s3223_s23 = smov 0   ;;  %s3225_s24 = smov 0  }
  0x11 LB: > { %3992 = sst [smem:[#allocation20_spill]] %s3114_s21  ;;  %s3240_s25 = sadd.s32 4294967295, %s3126_s24   ;;  %s3126_s24 = sphi %s3225_s24, %s4033_s24   ;;  %s3122_s23 = sphi %s3223_s23, %s4035_s23   ;;  %s3118_s22 = sphi %s3221_s22, %s4037_s22   ;;  %s3114_s21 = sphi %s3219_s21, %s4036_s21  }
  0x12   : > { %3993 = sst [smem:[#allocation21_spill]] %s3122_s23  ;;  %s2245_s26 = sadd.s32 4294967294, %s3126_s24  }
  0x13   : > { %p53_p0 = scmp.ne.s32.totalorder %s3118_s22, %s3114_s21  ;;  %p3973_p1 = scmp.eq.s32.totalorder %s3240_s25, 0 }
  0x14   : > { %p323_p2 = scmp.eq.s32.totalorder %s3240_s25, 1  ;;  %p329_p3 = scmp.eq.s32.totalorder %s2245_s26, 1 }
  0x15   : > { %p3249_p4 = por %p3973_p1, %p53_p0  ;;  %p2246_p5 = scmp.ge.s32.totalorder %s3126_s24, 1 }
  0x16   : > { %p3254_p6 = por %p329_p3, %p53_p0  ;;  %p336_p7 = scmp.lt.s32.totalorder %s3126_s24, 3 }
  0x17   : > { %s3994_s27 = scalar_select %p3249_p4, 1, 0 }
  0x18   : > { %s3995_s28 = scalar_select %p3254_p6, 1, 0 }
  0x19   : > { %p3259_p8 = pnand %p2246_p5, %p336_p7  ;;  %s3140_s30 = smov [#allocation8]  }
  0x1a   : > { %3996 = sst [smem:[#allocation22_spill]] %s3995_s28  ;;  %s348_s13 = sshll.u32 %s3140_s30, 4  ;;  %s349_s13 = int_to_ptr.vmem [resolvable:$true] %s348_s13 }
  0x1b   : > { %s3997_s29 = scalar_select %p3259_p8, 1, 0 }
  0x1c   : > { %p2547_p9 = pneg %p3259_p8  ;;  %s3141_s15 = smov [#allocation11]  }
  0x1d   : > { %s380_s16 = sshll.u32 %s3141_s15, 4  ;;  %s2861_s17 = scalar_lea.vmem %s349_s13, 4096  ;;  %s381_s16 = int_to_ptr.vmem [resolvable:$true] %s380_s16 }
  0x1e   : > { %p3268_p11 = pnand %p2547_p9, %p3973_p1  ;;  %p2862_p13 = scmp.ne.s32.totalorder %s349_s13, %s2861_s17 }
  0x1f   : > { %p2869_p5 = scmp.lt.s32.totalorder %s349_s13, %s349_s13  ;;  %p2870_p7 = scmp.lt.s32.totalorder %s2861_s17, %s2861_s17 }
  0x20   : > { %s3998_s14 = scalar_select %p3268_p11, 1, 0 }
  0x21   : > { %p3974_p12 = pneg %p3268_p11  ;;  %p2871_p10 = por %p2870_p7, %p2869_p5 }
  0x23   : > { %p2864_p0 = pnand %p2862_p13, %p3974_p12 }
  0x25   : > { %p2865_p3 = pneg %p2864_p0 }
  0x27   : > { %p2872_p9 = pnand %p2871_p10, %p2865_p3 }
  0x29   : > { %2875 = shalt.err (!%p2872_p9)
}
  0x2a   : > { %s3962_s18 = smov 128   ;;  %s3964_s19 = smov 8  }
  0x2b   : > { %s3999_s4 = sld [smem:[#allocation28_spill]]  ;;  %s2887_s30 = scalar_lea.vmem %s381_s16, 4096 }
  0x2c   : > { %p2888_p13 = scmp.ne.s32.totalorder %s381_s16, %s2887_s30  ;;  %p2895_p10 = scmp.lt.s32.totalorder %s381_s16, %s381_s16 }
  0x2d   : > { %p2896_p3 = scmp.lt.s32.totalorder %s2887_s30, %s2887_s30 }
  0x2e   : > { %p2890_p0 = pnand %p2888_p13, %p3974_p12 }
  0x2f   : > { %p2897_p7 = por %p2896_p3, %p2895_p10 }
  0x30   : > { %p2891_p5 = pneg %p2890_p0 }
  0x31   : > { %2550 = dma.hbm_to_vmem [thread:$0]  (!%p3268_p11), %s3999_s4, 4096, %s349_s13, [#allocation9], %s3962_s18, %s3962_s18, %s3964_s19  }
  0x32   : > { %p2898_p9 = pnand %p2897_p7, %p2891_p5 }
  0x34   : > { %2901 = shalt.err (!%p2898_p9)
}
  0x35   : > { %s4000_s8 = sld [smem:[#allocation30_spill]]  ;;  %s3297_s13 = sadd.s32 1, %s3126_s24  }
  0x36   : > { %4001 = sst [smem:[#allocation23_spill]] %s3297_s13  ;;  %s40_s20 = sadd.s32 1, %s3122_s23 }
  0x37   : > { %s37_s26 = ssub.s32 %s3126_s24, %s3297_s13  ;;  %p47_p13 = scmp.ne.s32.totalorder %s3122_s23, %s3118_s22 }
  0x38   : > { %p38_p0 = scmp.eq.s32.totalorder %s37_s26, 0  ;;  %p48_p5 = scmp.eq.s32.totalorder %s3126_s24, 0 }
  0x39   : > { %p3307_p10 = por %p323_p2, %p47_p13  ;;  %p2578_p3 = scmp.lt.s32.totalorder %s3126_s24, 2 }
  0x3a   : > { %s3313_s15 = scalar_select %p38_p0, %s3122_s23, %s40_s20  }
  0x3b   : > { %2556 = dma.hbm_to_vmem [thread:$0]  (!%p3268_p11), %s4000_s8, 4096, %s381_s16, [#allocation12], %s3962_s18, %s3962_s18, %s3964_s19  }
  0x3c   : > { %s4002_s30 = scalar_select %p3307_p10, 1, 0 }
  0x3d   : > { %4004 = sst [smem:[#allocation25_spill]] %s3313_s15  ;;  %p49_p7 = por %p48_p5, %p47_p13 }
  0x3e   : > { %4003 = sst [smem:[#allocation24_spill]] %s4002_s30  ;;  %s3316_s17 = sand.u32 1, %s3122_s23  }
  0x3f   : > { %s432_s16 = sand.u32 1, %s3126_s24   ;;  %s3971_s18 = sshll.u32 %s3316_s17, 8 }
  0x40   : > { %p3320_p9 = pnand %p2578_p3, %p49_p7  ;;  %s3972_s26 = sshll.u32 %s3126_s24, 12 }
  0x41   : > { %s4006_s1 = sld [smem:[#allocation26_spill]]  ;;  %s436_s20 = scalar_lea.vmem [#allocation5], %s3971_s18 }
  0x42   : > { %s443_s15 = sshll.u32 %s436_s20, 4  ;;  %s3336_s23 = scalar_lea.sflag [#allocation6], %s432_s16  ;;  %s3334_s15 = int_to_ptr.vmem [resolvable:$true] %s443_s15 }
  0x43   : > { %p3342_p13 = pneg %p3320_p9 }
  0x47   : > { %s3330_s13 = scalar_lea.hbm %s4006_s1, %s3972_s26  ;;  %s2907_s18 = scalar_lea.hbm %s4006_s1, 8192 }
  0x48   : > { %s2902_s28 = scalar_lea.hbm %s3330_s13, 4096  ;;  %p2908_p3 = scmp.lt.s32.totalorder %s3330_s13, %s4006_s1 }
  0x49   : > { %p2903_p2 = scmp.ne.s32.totalorder %s3330_s13, %s2902_s28  ;;  %p2909_p7 = scmp.lt.s32.totalorder %s2907_s18, %s2902_s28 }
  0x4b   : > { %p2905_p0 = pnand %p3342_p13, %p2903_p2  ;;  %p2910_p1 = por %p2909_p7, %p2908_p3 }
  0x4d   : > { %p2906_p5 = pneg %p2905_p0 }
  0x4f   : > { %p2911_p12 = pnand %p2910_p1, %p2906_p5 }
  0x51   : > { %2914 = shalt.err (!%p2911_p12)
}
  0x52   : > { %s2915_s16 = scalar_lea.vmem %s3334_s15, 4096  ;;  %s3144_s12 = smov [#allocation5]  }
  0x53   : > { %p2916_p6 = scmp.ne.s32.totalorder %s3334_s15, %s2915_s16  ;;  %s2920_s4 = sshll.u32 %s3144_s12, 4  ;;  %s2921_s4 = int_to_ptr.vmem [resolvable:$false] %s2920_s4 }
  0x54   : > { %s2922_s8 = scalar_lea.vmem %s2921_s4, 8192  ;;  %p2923_p10 = scmp.lt.s32.totalorder %s3334_s15, %s2921_s4 }
  0x55   : > { %p2918_p2 = pnand %p2916_p6, %p3342_p13  ;;  %p2924_p4 = scmp.lt.s32.totalorder %s2922_s8, %s2915_s16 }
  0x57   : > { %p2919_p0 = pneg %p2918_p2  ;;  %p2925_p8 = por %p2924_p4, %p2923_p10 }
  0x59   : > { %p2926_p11 = pnand %p2925_p8, %p2919_p0 }
  0x5b   : > { %2929 = shalt.err (!%p2926_p11)
}
  0x5c   : > { %s3983_s28 = smov 256   ;;  %s3984_s18 = smov 16  }
  0x5d   : > { %2566 = dma.hbm_to_vmem [thread:$0]  (!%p3320_p9), %s3330_s13, 4096, %s3334_s15, %s3336_s23, %s3983_s28, %s3983_s28, %s3984_s18  }
  0x5e   : > { %s4008_s12 = sshll.u32 %s3126_s24, 12  ;;  %s4009_s4 = sshll.u32 %s3316_s17, 8 }
  0x5f   : > { %s3373_s16 = scalar_lea.hbm %s3951_s2, %s4008_s12  ;;  %s457_s8 = scalar_lea.vmem [#allocation7], %s4009_s4 }
  0x60   : > { %s464_s1 = sshll.u32 %s457_s8, 4  ;;  %s3147_s30 = smov [#allocation10]   ;;  %s3377_s1 = int_to_ptr.vmem [resolvable:$true] %s464_s1 }
  0x61   : > { %s364_s11 = sshll.u32 %s3147_s30, 4  ;;  %p4010_p4 = scmp.ne.s32.totalorder %s3998_s14, 0  ;;  %s365_s11 = int_to_ptr.vmem [resolvable:$true] %s364_s11 }
  0x62   : > { %s2941_s3 = scalar_lea.vmem %s365_s11, 4096  ;;  %p2949_p12 = scmp.lt.s32.totalorder %s365_s11, %s365_s11 }
  0x63   : > { %p2942_p1 = scmp.ne.s32.totalorder %s365_s11, %s2941_s3  ;;  %p4011_p6 = pneg %p4010_p4 }
  0x64   : > { %p2950_p10 = scmp.lt.s32.totalorder %s2941_s3, %s2941_s3 }
  0x65   : > { %p2944_p8 = pnand %p2942_p1, %p4011_p6 }
  0x66   : > { %p2951_p5 = por %p2950_p10, %p2949_p12 }
  0x67   : > { %p2945_p11 = pneg %p2944_p8 }
  0x69   : > { %p2952_p3 = pnand %p2951_p5, %p2945_p11 }
  0x6b   : > { %2955 = shalt.err (!%p2952_p3)
}
  0x6c   : > { %s4012_s13 = smov 8   ;;  %s4013_s15 = smov 128  }
  0x6d   : > { %s4014_s6 = sld [smem:[#allocation29_spill]]  ;;  %s3148_s30 = smov [#allocation13]  }
  0x6e   : > { %s396_s20 = sshll.u32 %s3148_s30, 4  ;;  %s2252_s4 = sshll.u32 %s3316_s17, 4  ;;  %s397_s20 = int_to_ptr.vmem [resolvable:$true] %s396_s20 }
  0x6f   : > { %s2967_s8 = scalar_lea.vmem %s397_s20, 4096  ;;  %p4015_p2 = pmov %p4011_p6 }
  0x70   : > { %p2968_p7 = scmp.ne.s32.totalorder %s397_s20, %s2967_s8  ;;  %p2975_p6 = scmp.lt.s32.totalorder %s397_s20, %s397_s20 }
  0x71   : > { %p2976_p8 = scmp.lt.s32.totalorder %s2967_s8, %s2967_s8 }
  0x72   : > { %p2970_p0 = pnand %p2968_p7, %p4015_p2 }
  0x73   : > { %2553 = dma.hbm_to_vmem [thread:$0]  (!%p4010_p4), %s4014_s6, 4096, %s365_s11, [#allocation9], %s4013_s15, %s4013_s15, %s4012_s13  }
  0x74   : > { %p2971_p1 = pneg %p2970_p0  ;;  %p2977_p11 = por %p2976_p8, %p2975_p6 }
  0x76   : > { %p2978_p12 = pnand %p2977_p11, %p2971_p1 }
  0x78   : > { %2981 = shalt.err (!%p2978_p12)
}
  0x79   : > { %2559 = dma.hbm_to_vmem [thread:$0]  (!%p4010_p4), %s3959_s10, 4096, %s397_s20, [#allocation12], %s4013_s15, %s4013_s15, %s4012_s13  }
  0x7a   : > { %s2403_s12 = sshll.u32 %s3126_s24, 8  ;;  %s417_s14 = scalar_lea.vmem [#allocation2], %s2252_s4 }
  0x7b   : > { %s3406_s8 = scalar_lea.hbm %s3949_s0, %s2403_s12  ;;  %s425_s28 = sshll.u32 %s417_s14, 4  ;;  %s426_s28 = int_to_ptr.vmem [resolvable:$true] %s425_s28 }
  0x7c   : > { %s414_s18 = scalar_lea.sflag [#allocation3], %s3316_s17  ;;  %s2982_s6 = scalar_lea.hbm %s3406_s8, 256 }
  0x7d   : > { %p2983_p10 = scmp.ne.s32.totalorder %s3406_s8, %s2982_s6  ;;  %s2987_s15 = scalar_lea.hbm %s3949_s0, 512 }
  0x7e   : > { %p2988_p4 = scmp.lt.s32.totalorder %s3406_s8, %s3949_s0  ;;  %p2989_p7 = scmp.lt.s32.totalorder %s2987_s15, %s2982_s6 }
  0x7f   : > { %p2985_p5 = pnand %p2983_p10, %p3342_p13 }
  0x80   : > { %p2990_p2 = por %p2989_p7, %p2988_p4 }
  0x81   : > { %p2986_p3 = pneg %p2985_p5 }
  0x83   : > { %p2991_p0 = pnand %p2990_p2, %p2986_p3 }
  0x85   : > { %2994 = shalt.err (!%p2991_p0)
}
  0x86   : > { %s2995_s4 = scalar_lea.vmem %s426_s28, 256  ;;  %s3149_s17 = smov [#allocation2]  }
  0x87   : > { %p2996_p1 = scmp.ne.s32.totalorder %s426_s28, %s2995_s4  ;;  %s3000_s12 = sshll.u32 %s3149_s17, 4  ;;  %s3001_s12 = int_to_ptr.vmem [resolvable:$false] %s3000_s12 }
  0x88   : > { %s3002_s26 = scalar_lea.vmem %s3001_s12, 512  ;;  %p3003_p11 = scmp.lt.s32.totalorder %s426_s28, %s3001_s12 }
  0x89   : > { %p2998_p6 = pnand %p2996_p1, %p3342_p13  ;;  %p3004_p12 = scmp.lt.s32.totalorder %s3002_s26, %s2995_s4 }
  0x8b   : > { %p2999_p8 = pneg %p2998_p6  ;;  %p3005_p10 = por %p3004_p12, %p3003_p11 }
  0x8d   : > { %p3006_p5 = pnand %p3005_p10, %p2999_p8 }
  0x8f   : > { %3009 = shalt.err (!%p3006_p5)
}
  0x90   : > { %2563 = dma.hbm_to_vmem [thread:$0]  (!%p3320_p9), %s3406_s8, 256, %s426_s28, %s414_s18  }
  0x91   : > { %s3010_s6 = scalar_lea.hbm %s3373_s16, 4096  ;;  %s3015_s3 = scalar_lea.hbm %s3951_s2, 8192 }
  0x92   : > { %p3011_p3 = scmp.ne.s32.totalorder %s3373_s16, %s3010_s6  ;;  %p3016_p2 = scmp.lt.s32.totalorder %s3373_s16, %s3951_s2 }
  0x93   : > { %p3017_p0 = scmp.lt.s32.totalorder %s3015_s3, %s3010_s6 }
  0x94   : > { %p3013_p4 = pnand %p3011_p3, %p3342_p13 }
  0x95   : > { %p3018_p1 = por %p3017_p0, %p3016_p2 }
  0x96   : > { %p3014_p7 = pneg %p3013_p4 }
  0x98   : > { %p3019_p6 = pnand %p3018_p1, %p3014_p7 }
  0x9a   : > { %3022 = shalt.err (!%p3019_p6)
}
  0x9b   : > { %s3023_s28 = scalar_lea.vmem %s3377_s1, 4096  ;;  %s3150_s18 = smov [#allocation7]  }
  0x9c   : > { %p3024_p8 = scmp.ne.s32.totalorder %s3377_s1, %s3023_s28  ;;  %s3028_s8 = sshll.u32 %s3150_s18, 4  ;;  %s3029_s8 = int_to_ptr.vmem [resolvable:$false] %s3028_s8 }
  0x9d   : > { %s3030_s20 = scalar_lea.vmem %s3029_s8, 8192  ;;  %p3031_p10 = scmp.lt.s32.totalorder %s3377_s1, %s3029_s8 }
  0x9e   : > { %p3026_p11 = pnand %p3024_p8, %p3342_p13  ;;  %p3032_p5 = scmp.lt.s32.totalorder %s3030_s20, %s3023_s28 }
  0xa0   : > { %p3027_p12 = pneg %p3026_p11  ;;  %p3033_p3 = por %p3032_p5, %p3031_p10 }
  0xa2   : > { %p3034_p4 = pnand %p3033_p3, %p3027_p12 }
  0xa4   : > { %3037 = shalt.err (!%p3034_p4)
}
  0xa5   : > { %s4016_s11 = smov 16   ;;  %s4017_s4 = smov 256  }
  0xa6   : > { %2569 = dma.hbm_to_vmem [thread:$0]  (!%p3320_p9), %s3373_s16, 4096, %s3377_s1, %s3336_s23, %s4017_s4, %s4017_s4, %s4016_s11  }
  0xa7   : > { %p4018_p13 = scmp.ne.s32.totalorder %s3997_s29, 0 }
  0xa8   : > { %s3452_s21 = sand.u32 (!%p4018_p13), 1, %s3118_s22   ;;  %p4019_p7 = scmp.ne.s32.totalorder (!%p4018_p13), %s3994_s27, 0 }
  0xa9   : > { %482 = sbr.rel (%p4018_p13) target bundleno = 1802 (0x70a), region = 68  ;;  %s2262_s17 = sshll.u32 (!%p4018_p13), %s3452_s21, 4 }
  0xaa   : > { %s485_s12 = scalar_lea.sflag (!%p4018_p13), [#allocation3], %s3452_s21  ;;  %s3458_s19 = scalar_lea.vmem (!%p4018_p13), [#allocation2], %s2262_s17 }
  0xae   : > { %3093 = dma.done.wait (%p4019_p7), %s485_s12, 256  }
  0xaf   : > { %3095 = vsyncadd (%p4019_p7), %s485_s12, 4294967040  ;;  %s493_s1 = sand.u32 1, %s3240_s25   ;;  %s2263_s23 = sshll.u32 %s3452_s21, 8 }
  0xb0   : > { %s494_s29 = scalar_lea.sflag [#allocation6], %s493_s1  ;;  %s3466_s16 = scalar_lea.vmem [#allocation5], %s2263_s23 }
  0xb1   : > { %3097 = dma.done.wait (%p4019_p7), %s494_s29, 8192  }
  0xb2   : > { %3099 = vsyncadd (%p4019_p7), %s494_s29, 4294959104  ;;  %s3472_s26 = scalar_lea.vmem [#allocation7], %s2263_s23  ;;  %p4020_p9 = scmp.eq.s32.totalorder %s3240_s25, 0 }
  0xb4   : > { %3101 = dma.done.wait (%p4020_p9), [#allocation9], 8192   ;;  %p4021_p2 = pmov %p4020_p9 }
  0xb6   : > { %3103 = vsyncadd (%p4021_p2), [#allocation9], 4294959104  ;;  %p4022_p0 = pmov %p4021_p2 }
  0xb8   : > { %3105 = dma.done.wait (%p4022_p0), [#allocation12], 8192   ;;  %p4023_p1 = pmov %p4022_p0 }
  0xb9   : > { %v2650_v0 = vld [vmem:[#allocation10 + $0x74] ss:$8 sps:$4 sm:$0xff]   ;;  %v2652_v1 = vld [vmem:[#allocation10 + $0x70] ss:$8 sps:$4 sm:$0xff]   ;;  %v2653_v2 = vld [vmem:[#allocation10 + $0x64] ss:$8 sps:$4 sm:$0xff]  }
  0xba   : > { %3107 = vsyncadd (%p4023_p1), [#allocation12], 4294959104  ;;  %1114 = vmatprep.subr.bf16.mxu1 %v2650_v0  ;;  %v2655_v3 = vld [vmem:[#allocation10 + $0x60] ss:$8 sps:$4 sm:$0xff]   ;;  %v2656_v4 = vld [vmem:[#allocation10 + $0x54] ss:$8 sps:$4 sm:$0xff]  }
  0xbb   : > { %1115 = vmatpush1.bf16.msra.mxu1 %v2652_v1  ;;  %v2658_v5 = vld [vmem:[#allocation10 + $0x50] ss:$8 sps:$4 sm:$0xff]   ;;  %v2659_v6 = vld [vmem:[#allocation10 + $0x44] ss:$8 sps:$4 sm:$0xff]   ;;  %v2661_v7 = vld [vmem:[#allocation10 + $0x40] ss:$8 sps:$4 sm:$0xff]  }
  0xbc   : > { %1116 = vmatprep.subr.bf16.mxu1 %v2653_v2  ;;  %v2662_v8 = vld [vmem:[#allocation10 + $0x34] ss:$8 sps:$4 sm:$0xff]   ;;  %v2664_v9 = vld [vmem:[#allocation10 + $0x30] ss:$8 sps:$4 sm:$0xff]   ;;  %v2665_v10 = vld [vmem:[#allocation10 + $0x24] ss:$8 sps:$4 sm:$0xff]  }
  0xbd   : > { %v2667_v11 = vld [vmem:[#allocation10 + $0x20] ss:$8 sps:$4 sm:$0xff]   ;;  %v2668_v12 = vld [vmem:[#allocation10 + $0x14] ss:$8 sps:$4 sm:$0xff]   ;;  %v2670_v16 = vld [vmem:[#allocation10 + $0x10] ss:$8 sps:$4 sm:$0xff]  }
  0xbe   : > { %v583_v13 = vld [vmem:[%s3466_s16 + $0x8] sm:$0xff]  ;;  %v585_v14 = vld [vmem:[%s3466_s16 + $0x18] sm:$0xff]  ;;  %v582_v53 = vld [vmem:[%s3466_s16] sm:$0xff]  ;;  %vm3152_vm0 = vmmov 0   ;;  %p576_p6 = scmp.lt.s32.totalorder %s3240_s25, 1  ;;  %s4024_s8 = sld [smem:[#allocation27_spill]] }
  0xbf   : > { %1117 = vmatpush1.bf16.msra.mxu1 %v2655_v3  ;;  %v895_v15 = vpack.c.bf16 %v585_v14, %v583_v13  ;;  %v2671_v17 = vld [vmem:[#allocation10 + $0x4] ss:$8 sps:$4 sm:$0xff]   ;;  %v2673_v18 = vld [vmem:[#allocation10] ss:$8 sps:$4 sm:$0xff]   ;;  %v2674_v19 = vld [vmem:[#allocation10 + $0xf4] ss:$8 sps:$4 sm:$0xff]  }
  0xc0   : > { %1118 = vmatprep.subr.bf16.mxu1 %v2656_v4  ;;  %v2676_v20 = vld [vmem:[#allocation10 + $0xf0] ss:$8 sps:$4 sm:$0xff]   ;;  %v2698_v21 = vld [vmem:[#allocation8 + $0x74] ss:$8 sps:$4 sm:$0xff]   ;;  %v2677_v23 = vld [vmem:[#allocation10 + $0xe4] ss:$8 sps:$4 sm:$0xff]  }
  0xc1   : > { %1146 = vmatprep.mubr.bf16.mxu1 %v895_v15  ;;  %v2700_v22 = vld [vmem:[#allocation8 + $0x70] ss:$8 sps:$4 sm:$0xff]   ;;  %853 = vmatprep.subr.bf16.mxu0 %v2698_v21  ;;  %v2701_v24 = vld [vmem:[#allocation8 + $0x64] ss:$8 sps:$4 sm:$0xff]   ;;  %v2703_v25 = vld [vmem:[#allocation8 + $0x60] ss:$8 sps:$4 sm:$0xff]  }
  0xc2   : > { %854 = vmatpush1.bf16.msra.mxu0 %v2700_v22  ;;  %v2679_v26 = vld [vmem:[#allocation10 + $0xe0] ss:$8 sps:$4 sm:$0xff]   ;;  %v2704_v27 = vld [vmem:[#allocation8 + $0x54] ss:$8 sps:$4 sm:$0xff]   ;;  %v2706_v29 = vld [vmem:[#allocation8 + $0x50] ss:$8 sps:$4 sm:$0xff]  }
  0xc3   : > { %1119 = vmatpush1.bf16.msra.mxu1 %v2658_v5  ;;  %v2680_v28 = vld [vmem:[#allocation10 + $0xd4] ss:$8 sps:$4 sm:$0xff]   ;;  %855 = vmatprep.subr.bf16.mxu0 %v2701_v24  ;;  %v2682_v30 = vld [vmem:[#allocation10 + $0xd0] ss:$8 sps:$4 sm:$0xff]   ;;  %v2707_v31 = vld [vmem:[#allocation8 + $0x44] ss:$8 sps:$4 sm:$0xff]  }
  0xc4   : > { %1120 = vmatprep.subr.bf16.mxu1 %v2659_v6  ;;  %v2683_v32 = vld [vmem:[#allocation10 + $0xc4] ss:$8 sps:$4 sm:$0xff]   ;;  %v2709_v33 = vld [vmem:[#allocation8 + $0x40] ss:$8 sps:$4 sm:$0xff]   ;;  %v2710_v35 = vld [vmem:[#allocation8 + $0x34] ss:$8 sps:$4 sm:$0xff]  }
  0xc5   : > { %v2685_v34 = vld [vmem:[#allocation10 + $0xc0] ss:$8 sps:$4 sm:$0xff]   ;;  %v2686_v36 = vld [vmem:[#allocation10 + $0xb4] ss:$8 sps:$4 sm:$0xff]   ;;  %v2712_v37 = vld [vmem:[#allocation8 + $0x30] ss:$8 sps:$4 sm:$0xff]  }
  0xc6   : > { %856 = vmatpush1.bf16.msra.mxu0 %v2703_v25  ;;  %v2688_v38 = vld [vmem:[#allocation10 + $0xb0] ss:$8 sps:$4 sm:$0xff]   ;;  %v2713_v39 = vld [vmem:[#allocation8 + $0x24] ss:$8 sps:$4 sm:$0xff]   ;;  %v2715_v41 = vld [vmem:[#allocation8 + $0x20] ss:$8 sps:$4 sm:$0xff]  }
  0xc7   : > { %1121 = vmatpush1.bf16.msra.mxu1 %v2661_v7  ;;  %857 = vmatprep.subr.bf16.mxu0 %v2704_v27  ;;  %v2689_v40 = vld [vmem:[#allocation10 + $0xa4] ss:$8 sps:$4 sm:$0xff]   ;;  %v2691_v42 = vld [vmem:[#allocation10 + $0xa0] ss:$8 sps:$4 sm:$0xff]   ;;  %v2716_v43 = vld [vmem:[#allocation8 + $0x14] ss:$8 sps:$4 sm:$0xff]  }
  0xc8   : > { %1122 = vmatprep.subr.bf16.mxu1 %v2662_v8  ;;  %v2692_v44 = vld [vmem:[#allocation10 + $0x94] ss:$8 sps:$4 sm:$0xff]   ;;  %v2694_v45 = vld [vmem:[#allocation10 + $0x90] ss:$8 sps:$4 sm:$0xff]   ;;  %v2695_v49 = vld [vmem:[#allocation10 + $0x84] ss:$8 sps:$4 sm:$0xff]  }
  0xc9   : > { %v581_v46 = vld [vmem:[%s3458_s19 + $0x8] sm:$0xff]  ;;  %v584_v54 = vld [vmem:[%s3466_s16 + $0x10] sm:$0xff]  ;;  %v586_v63 = vld [vmem:[%s3466_s16 + $0x20] sm:$0xff]  ;;  %s577_s15 = scalar_select %p576_p6, %s3240_s25, 1 }
  0xca   : > { %858 = vmatpush1.bf16.msra.mxu0 %v2706_v29  ;;  %v2718_v47 = vld [vmem:[#allocation8 + $0x10] ss:$8 sps:$4 sm:$0xff]   ;;  %v648_v48 = vpack.c.bf16 %v581_v46, %v581_v46  ;;  %v2719_v50 = vld [vmem:[#allocation8 + $0x4] ss:$8 sps:$4 sm:$0xff]   ;;  %v2721_v51 = vld [vmem:[#allocation8] ss:$8 sps:$4 sm:$0xff]   ;;  %v894_v60 = vpack.c.bf16 %v584_v54, %v582_v53 }
  0xcb   : > { %1123 = vmatpush1.bf16.msra.mxu1 %v2664_v9  ;;  %859 = vmatprep.subr.bf16.mxu0 %v2707_v31  ;;  %v2697_v52 = vld [vmem:[#allocation10 + $0x80] ss:$8 sps:$4 sm:$0xff]   ;;  %v2722_v55 = vld [vmem:[#allocation8 + $0xf4] ss:$8 sps:$4 sm:$0xff]   ;;  %v2724_v58 = vld [vmem:[#allocation8 + $0xf0] ss:$8 sps:$4 sm:$0xff]   ;;  %s578_s20 = scalar_lea.vmem %s4024_s8, %s577_s15 }
  0xcc   : > { %1124 = vmatprep.subr.bf16.mxu1 %v2665_v10  ;;  %885 = vmatprep.mubr.bf16.mxu0 %v648_v48  ;;  %v587_v56 = vld [vmem:[%s3466_s16 + $0x28] sm:$0xff]  ;;  %v589_v57 = vld [vmem:[%s3466_s16 + $0x38] sm:$0xff]  ;;  %v588_v0 = vld [vmem:[%s3466_s16 + $0x30] sm:$0xff]  ;;  %s3830_s11 = scalar_lea.vmem [#allocation14], %s2262_s17  ;;  %s3136_s4 = smov 0  }
  0xcd   : > { %v2725_v59 = vld [vmem:[#allocation8 + $0xe4] ss:$8 sps:$4 sm:$0xff]   ;;  %v897_v61 = vpack.c.bf16 %v589_v57, %v587_v56  ;;  %v2727_v62 = vld [vmem:[#allocation8 + $0xe0] ss:$8 sps:$4 sm:$0xff]   ;;  %v2728_v1 = vld [vmem:[#allocation8 + $0xd4] ss:$8 sps:$4 sm:$0xff]   ;;  %v896_v4 = vpack.c.bf16 %v588_v0, %v586_v63 }
  0xce   : > { %860 = vmatpush1.bf16.msra.mxu0 %v2709_v33  ;;  %v591_v2 = vld [vmem:[%s3466_s16 + $0x48] sm:$0xff]  ;;  %v593_v3 = vld [vmem:[%s3466_s16 + $0x58] sm:$0xff]  ;;  %v590_v9 = vld [vmem:[%s3466_s16 + $0x40] sm:$0xff] }
  0xcf   : > { %1125 = vmatpush1.bf16.msra.mxu1 %v2667_v11  ;;  %861 = vmatprep.subr.bf16.mxu0 %v2710_v35  ;;  %v2730_v5 = vld [vmem:[#allocation8 + $0xd0] ss:$8 sps:$4 sm:$0xff]   ;;  %v899_v6 = vpack.c.bf16 %v593_v3, %v591_v2  ;;  %v2731_v7 = vld [vmem:[#allocation8 + $0xc4] ss:$8 sps:$4 sm:$0xff]   ;;  %v2733_v8 = vld [vmem:[#allocation8 + $0xc0] ss:$8 sps:$4 sm:$0xff]  }
  0xd0   : > { %1126 = vmatprep.subr.bf16.mxu1 %v2668_v12  ;;  %v592_v10 = vld [vmem:[%s3466_s16 + $0x50] sm:$0xff]  ;;  %v595_v12 = vld [vmem:[%s3466_s16 + $0x68] sm:$0xff]  ;;  %v597_v13 = vld [vmem:[%s3466_s16 + $0x78] sm:$0xff] }
  0xd1   : > { %v2734_v11 = vld [vmem:[#allocation8 + $0xb4] ss:$8 sps:$4 sm:$0xff]   ;;  %v898_v14 = vpack.c.bf16 %v592_v10, %v590_v9  ;;  %v2736_v15 = vld [vmem:[#allocation8 + $0xb0] ss:$8 sps:$4 sm:$0xff]   ;;  %v599_v22 = vld [vmem:[%s3466_s16 + $0x88] sm:$0xff] }
  0xd2   : > { %862 = vmatpush1.bf16.msra.mxu0 %v2712_v37  ;;  %v2740_v21 = vld [vmem:[#allocation8 + $0x94] ss:$8 sps:$4 sm:$0xff]   ;;  %v2742_v25 = vld [vmem:[#allocation8 + $0x90] ss:$8 sps:$4 sm:$0xff]   ;;  %v2743_v27 = vld [vmem:[#allocation8 + $0x84] ss:$8 sps:$4 sm:$0xff]  }
  0xd3   : > { %1127 = vmatpush1.bf16.msra.mxu1 %v2670_v16  ;;  %863 = vmatprep.subr.bf16.mxu0 %v2713_v39  ;;  %v901_v16 = vpack.c.bf16 %v597_v13, %v595_v12  ;;  %v580_v29 = vld [vmem:[%s3458_s19] sm:$0xff]  ;;  %v603_v33 = vld [vmem:[%s3466_s16 + $0xa8] sm:$0xff]  ;;  %v613_v48 = vld [vmem:[%s3466_s16 + $0xf8] sm:$0xff] }
  0xd4   : > { %1128 = vmatprep.subr.bf16.mxu1 %v2671_v17  ;;  %v2737_v17 = vld [vmem:[#allocation8 + $0xa4] ss:$8 sps:$4 sm:$0xff]   ;;  %v600_v31 = vld [vmem:[%s3466_s16 + $0x90] sm:$0xff]  ;;  %v647_v35 = vpack.c.bf16 %v580_v29, %v580_v29  ;;  %v2761_v63 = vld [vmem:[#allocation11 + $0x20] ss:$8 sps:$4 sm:$0xff]  }
  0xd5   : > { %v2746_v37 = vld [vmem:[#allocation11 + $0x70] ss:$8 sps:$4 sm:$0xff]   ;;  %v602_v39 = vld [vmem:[%s3466_s16 + $0xa0] sm:$0xff]  ;;  %v2754_v56 = vld [vmem:[#allocation11 + $0x54] ss:$8 sps:$4 sm:$0xff]  }
  0xd6   : > { %864 = vmatpush1.bf16.msra.mxu0 %v2715_v41  ;;  %v607_v41 = vld [vmem:[%s3466_s16 + $0xc8] sm:$0xff]  ;;  %v608_v46 = vld [vmem:[%s3466_s16 + $0xd0] sm:$0xff] }
  0xd7   : > { %1129 = vmatpush1.bf16.msra.mxu1 %v2673_v18  ;;  %865 = vmatprep.subr.bf16.mxu0 %v2716_v43  ;;  %v2739_v18 = vld [vmem:[#allocation8 + $0xa0] ss:$8 sps:$4 sm:$0xff]   ;;  %v2751_v54 = vld [vmem:[#allocation11 + $0x64] ss:$8 sps:$4 sm:$0xff]   ;;  %v2752_v57 = vld [vmem:[#allocation11 + $0x50] ss:$8 sps:$4 sm:$0xff]  }
  0xd8   : > { %1130 = vmatprep.subr.bf16.mxu1 %v2674_v19  ;;  %v594_v19 = vld [vmem:[%s3466_s16 + $0x60] sm:$0xff]  ;;  %v2766_v0 = vld [vmem:[#allocation11 + $0x14] ss:$8 sps:$4 sm:$0xff]   ;;  %v2776_v9 = vld [vmem:[#allocation11 + $0xd0] ss:$8 sps:$4 sm:$0xff]  }
  0xd9   : > { %v2769_v2 = vld [vmem:[#allocation11 + $0x4] ss:$8 sps:$4 sm:$0xff]   ;;  %v2767_v3 = vld [vmem:[#allocation11] ss:$8 sps:$4 sm:$0xff]   ;;  %v2784_v12 = vld [vmem:[#allocation11 + $0xb4] ss:$8 sps:$4 sm:$0xff]  }
  0xda   : > { %866 = vmatpush1.bf16.msra.mxu0 %v2718_v47  ;;  %v611_v47 = vld [vmem:[%s3466_s16 + $0xe8] sm:$0xff]  ;;  %v2782_v13 = vld [vmem:[#allocation11 + $0xb0] ss:$8 sps:$4 sm:$0xff]  }
  0xdb   : > { %1131 = vmatpush2.bf16.msra.mxu1 %v2676_v20  ;;  %867 = vmatprep.subr.bf16.mxu0 %v2719_v50  ;;  %v596_v20 = vld [vmem:[%s3466_s16 + $0x70] sm:$0xff]  ;;  %v909_v50 = vpack.c.bf16 %v613_v48, %v611_v47  ;;  %v2781_v10 = vld [vmem:[#allocation11 + $0xc4] ss:$8 sps:$4 sm:$0xff]  }
  0xdc   : > { %1132 = vmatprep.subr.bf16.mxu1 %v2677_v23  ;;  %v601_v23 = vld [vmem:[%s3466_s16 + $0x98] sm:$0xff]  ;;  %v900_v24 = vpack.c.bf16 %v596_v20, %v594_v19  ;;  %v2791_v19 = vld [vmem:[#allocation11 + $0x80] ss:$8 sps:$4 sm:$0xff]  }
  0xdd   : > { %v615_v20 = vld [vmem:[%s3472_s26 + $0x8] sm:$0xff]  ;;  %v630_v48 = vld [vmem:[%s3472_s26 + $0x80] sm:$0xff] }
  0xde   : > { %868 = vmatpush1.bf16.msra.mxu0 %v2721_v51  ;;  %v610_v51 = vld [vmem:[%s3466_s16 + $0xe0] sm:$0xff] }
  0xdf   : > { %1133 = vmatpush2.bf16.msra.mxu1 %v2679_v26  ;;  %869 = vmatprep.subr.bf16.mxu0 %v2722_v55  ;;  %v903_v26 = vpack.c.bf16 %v601_v23, %v599_v22  ;;  %v2749_v55 = vld [vmem:[#allocation11 + $0x60] ss:$8 sps:$4 sm:$0xff]  }
  0xe0   : > { %1134 = vmatprep.subr.bf16.mxu1 %v2680_v28  ;;  %v2745_v28 = vld [vmem:[#allocation8 + $0x80] ss:$8 sps:$4 sm:$0xff]  }
  0xe1   : > { %v614_v23 = vld [vmem:[%s3472_s26] sm:$0xff] }
  0xe2   : > { %870 = vmatpush2.bf16.msra.mxu0 %v2724_v58  ;;  %v2757_v58 = vld [vmem:[#allocation11 + $0x44] ss:$8 sps:$4 sm:$0xff]  }
  0xe3   : > { %1135 = vmatpush2.bf16.msra.mxu1 %v2682_v30  ;;  %871 = vmatprep.subr.bf16.mxu0 %v2725_v59  ;;  %v598_v30 = vld [vmem:[%s3466_s16 + $0x80] sm:$0xff] }
  0xe4   : > { %1136 = vmatprep.subr.bf16.mxu1 %v2683_v32  ;;  %v2748_v32 = vld [vmem:[#allocation11 + $0x74] ss:$8 sps:$4 sm:$0xff]   ;;  %v2755_v59 = vld [vmem:[#allocation11 + $0x40] ss:$8 sps:$4 sm:$0xff]  }
  0xe6   : > { %872 = vmatpush2.bf16.msra.mxu0 %v2727_v62  ;;  %v2763_v62 = vld [vmem:[#allocation11 + $0x24] ss:$8 sps:$4 sm:$0xff]  }
  0xe7   : > { %1137 = vmatpush2.bf16.msra.mxu1 %v2685_v34  ;;  %873 = vmatprep.subr.bf16.mxu0 %v2728_v1  ;;  %v605_v34 = vld [vmem:[%s3466_s16 + $0xb8] sm:$0xff] }
  0xe8   : > { %1138 = vmatprep.subr.bf16.mxu1 %v2686_v36  ;;  %v902_v36 = vpack.c.bf16 %v600_v31, %v598_v30  ;;  %v2764_v1 = vld [vmem:[#allocation11 + $0x10] ss:$8 sps:$4 sm:$0xff]   ;;  %v618_v30 = vld [vmem:[%s3472_s26 + $0x20] sm:$0xff] }
  0xe9   : > { %v620_v31 = vld [vmem:[%s3472_s26 + $0x30] sm:$0xff] }
  0xea   : > { %874 = vmatpush2.bf16.msra.mxu0 %v2730_v5  ;;  %v2770_v5 = vld [vmem:[#allocation11 + $0xf0] ss:$8 sps:$4 sm:$0xff]  }
  0xeb   : > { %1139 = vmatpush2.bf16.msra.mxu1 %v2688_v38  ;;  %875 = vmatprep.subr.bf16.mxu0 %v2731_v7  ;;  %v905_v38 = vpack.c.bf16 %v605_v34, %v603_v33  ;;  %v2773_v7 = vld [vmem:[#allocation11 + $0xe0] ss:$8 sps:$4 sm:$0xff]   ;;  %v625_v34 = vld [vmem:[%s3472_s26 + $0x58] sm:$0xff] }
  0xec   : > { %1140 = vmatprep.subr.bf16.mxu1 %v2689_v40  ;;  %v604_v40 = vld [vmem:[%s3466_s16 + $0xb0] sm:$0xff]  ;;  %v623_v33 = vld [vmem:[%s3472_s26 + $0x48] sm:$0xff] }
  0xed   : > { %v904_v43 = vpack.c.bf16 %v604_v40, %v602_v39  ;;  %v627_v39 = vld [vmem:[%s3472_s26 + $0x68] sm:$0xff]  ;;  %v629_v40 = vld [vmem:[%s3472_s26 + $0x78] sm:$0xff] }
  0xee   : > { %876 = vmatpush2.bf16.msra.mxu0 %v2733_v8  ;;  %v2778_v8 = vld [vmem:[#allocation11 + $0xd4] ss:$8 sps:$4 sm:$0xff]  }
  0xef   : > { %1141 = vmatpush2.bf16.msra.mxu1 %v2691_v42  ;;  %877 = vmatprep.subr.bf16.mxu0 %v2734_v11  ;;  %v609_v42 = vld [vmem:[%s3466_s16 + $0xd8] sm:$0xff]  ;;  %v2779_v11 = vld [vmem:[#allocation11 + $0xc0] ss:$8 sps:$4 sm:$0xff]  }
  0xf0   : > { %1142 = vmatprep.subr.bf16.mxu1 %v2692_v44  ;;  %v907_v44 = vpack.c.bf16 %v609_v42, %v607_v41  ;;  %v1234_v41 = vpack.c.bf16 %v629_v40, %v627_v39  ;;  %v626_v42 = vld [vmem:[%s3472_s26 + $0x60] sm:$0xff] }
  0xf2   : > { %878 = vmatpush2.bf16.msra.mxu0 %v2736_v15  ;;  %v2785_v15 = vld [vmem:[#allocation11 + $0xa0] ss:$8 sps:$4 sm:$0xff]  }
  0xf3   : > { %1143 = vmatpush2.bf16.msra.mxu1 %v2694_v45  ;;  %879 = vmatprep.subr.bf16.mxu0 %v2737_v17  ;;  %v606_v45 = vld [vmem:[%s3466_s16 + $0xc0] sm:$0xff]  ;;  %v2788_v17 = vld [vmem:[#allocation11 + $0x90] ss:$8 sps:$4 sm:$0xff]  }
  0xf4   : > { %1144 = vmatprep.subr.bf16.mxu1 %v2695_v49  ;;  %v906_v49 = vpack.c.bf16 %v608_v46, %v606_v45  ;;  %v631_v45 = vld [vmem:[%s3472_s26 + $0x88] sm:$0xff]  ;;  %v633_v46 = vld [vmem:[%s3472_s26 + $0x98] sm:$0xff] }
  0xf5   : > { %v1236_v47 = vpack.c.bf16 %v633_v46, %v631_v45 }
  0xf6   : > { %880 = vmatpush2.bf16.msra.mxu0 %v2739_v18  ;;  %v2793_v18 = vld [vmem:[#allocation11 + $0x84] ss:$8 sps:$4 sm:$0xff]  }
  0xf7   : > { %1145 = vmatpush2.bf16.msra.mxu1 %v2697_v52  ;;  %881 = vmatprep.subr.bf16.mxu0 %v2740_v21  ;;  %v612_v52 = vld [vmem:[%s3466_s16 + $0xf0] sm:$0xff]  ;;  %v617_v21 = vld [vmem:[%s3472_s26 + $0x18] sm:$0xff] }
  0xf8   : > { %v908_v53 = vpack.c.bf16 %v612_v52, %v610_v51  ;;  %v1228_v22 = vpack.c.bf16 %v617_v21, %v615_v20  ;;  %v635_v51 = vld [vmem:[%s3472_s26 + $0xa8] sm:$0xff]  ;;  %v637_v52 = vld [vmem:[%s3472_s26 + $0xb8] sm:$0xff] }
  0xfa   : > { %1147 = vmatmul.mubr.bf16.vlgmr.msra.gmra.mxu1 %v894_v60  ;;  %882 = vmatpush2.bf16.msra.mxu0 %v2742_v25  ;;  %v2760_v60 = vld [vmem:[#allocation11 + $0x34] ss:$8 sps:$4 sm:$0xff]  }
  0xfb   : > { %1156 = vmatprep.mubr.bf16.mxu1 %v897_v61  ;;  %883 = vmatprep.subr.bf16.mxu0 %v2743_v27  ;;  %v2758_v61 = vld [vmem:[#allocation11 + $0x30] ss:$8 sps:$4 sm:$0xff]   ;;  %v619_v27 = vld [vmem:[%s3472_s26 + $0x28] sm:$0xff] }
  0xfe   : > { %884 = vmatpush2.bf16.msra.mxu0 %v2745_v28  ;;  %v621_v28 = vld [vmem:[%s3472_s26 + $0x38] sm:$0xff] }
  0xff   : > { %1447 = vmatprep.subr.bf16.mxu0 %v2748_v32  ;;  %v1230_v29 = vpack.c.bf16 %v621_v28, %v619_v27  ;;  %v1229_v32 = vpack.c.bf16 %v620_v31, %v618_v30 }
 0x101   : > { %886 = vmatmul.mubr.bf16.vlgmr.msra.gmra.mxu0 %v647_v35  ;;  %v1232_v35 = vpack.c.bf16 %v625_v34, %v623_v33 }
 0x102   : > { %1157 = vmatmul.mubr.bf16.gmra.mxu1 %v896_v4  ;;  %1448 = vmatpush1.bf16.msra.mxu0 %v2746_v37  ;;  %v2772_v4 = vld [vmem:[#allocation11 + $0xf4] ss:$8 sps:$4 sm:$0xff]  }
 0x103   : > { %1166 = vmatprep.mubr.bf16.mxu1 %v899_v6  ;;  %1449 = vmatprep.subr.bf16.mxu0 %v2751_v54  ;;  %v2775_v6 = vld [vmem:[#allocation11 + $0xe4] ss:$8 sps:$4 sm:$0xff]   ;;  %v624_v37 = vld [vmem:[%s3472_s26 + $0x50] sm:$0xff] }
 0x104   : > { %1479 = vmatprep.mubr.bf16.mxu0 %v1228_v22  ;;  %v634_v54 = vld [vmem:[%s3472_s26 + $0xa0] sm:$0xff] }
 0x106   : > { %1450 = vmatpush1.bf16.msra.mxu0 %v2749_v55  ;;  %v636_v55 = vld [vmem:[%s3472_s26 + $0xb0] sm:$0xff] }
 0x107   : > { %1451 = vmatprep.subr.bf16.mxu0 %v2754_v56  ;;  %v1237_v56 = vpack.c.bf16 %v636_v55, %v634_v54 }
 0x10a   : > { %1167 = vmatmul.mubr.bf16.gmra.mxu1 %v898_v14  ;;  %1452 = vmatpush1.bf16.msra.mxu0 %v2752_v57  ;;  %v2787_v14 = vld [vmem:[#allocation11 + $0xa4] ss:$8 sps:$4 sm:$0xff]  }
 0x10b   : > { %1176 = vmatprep.mubr.bf16.mxu1 %v901_v16  ;;  %1453 = vmatprep.subr.bf16.mxu0 %v2757_v58  ;;  %v2790_v16 = vld [vmem:[#allocation11 + $0x94] ss:$8 sps:$4 sm:$0xff]   ;;  %v639_v57 = vld [vmem:[%s3472_s26 + $0xc8] sm:$0xff] }
 0x10c   : > { %v641_v58 = vld [vmem:[%s3472_s26 + $0xd8] sm:$0xff] }
 0x10e   : > { %1454 = vmatpush1.bf16.msra.mxu0 %v2755_v59  ;;  %v1240_v59 = vpack.c.bf16 %v641_v58, %v639_v57 }
 0x10f   : > { %1455 = vmatprep.subr.bf16.mxu0 %v2760_v60  ;;  %v638_v60 = vld [vmem:[%s3472_s26 + $0xc0] sm:$0xff] }
 0x112   : > { %1177 = vmatmul.mubr.bf16.gmra.mxu1 %v900_v24  ;;  %1456 = vmatpush1.bf16.msra.mxu0 %v2758_v61  ;;  %v616_v24 = vld [vmem:[%s3472_s26 + $0x10] sm:$0xff] }
 0x113   : > { %1186 = vmatprep.mubr.bf16.mxu1 %v903_v26  ;;  %1457 = vmatprep.subr.bf16.mxu0 %v2763_v62  ;;  %v1227_v25 = vpack.c.bf16 %v616_v24, %v614_v23  ;;  %v3151_v26 = vmov 0.0   ;;  %v640_v61 = vld [vmem:[%s3472_s26 + $0xd0] sm:$0xff] }
 0x114   : > { %2443 = vmatprep.subr.bf16.mxu1 %v3151_v26  ;;  %v1239_v62 = vpack.c.bf16 %v640_v61, %v638_v60 }
 0x116   : > { %1458 = vmatpush1.bf16.msra.mxu0 %v2761_v63  ;;  %v643_v63 = vld [vmem:[%s3472_s26 + $0xe8] sm:$0xff] }
 0x117   : > { %1459 = vmatprep.subr.bf16.mxu0 %v2766_v0  ;;  %v645_v0 = vld [vmem:[%s3472_s26 + $0xf8] sm:$0xff] }
 0x11a   : > { %1187 = vmatmul.mubr.bf16.gmra.mxu1 %v902_v36  ;;  %1460 = vmatpush1.bf16.msra.mxu0 %v2764_v1  ;;  %v622_v36 = vld [vmem:[%s3472_s26 + $0x40] sm:$0xff]  ;;  %v1242_v1 = vpack.c.bf16 %v645_v0, %v643_v63 }
 0x11b   : > { %1196 = vmatprep.mubr.bf16.mxu1 %v905_v38  ;;  %1461 = vmatprep.subr.bf16.mxu0 %v2769_v2  ;;  %v1231_v38 = vpack.c.bf16 %v624_v37, %v622_v36  ;;  %v642_v2 = vld [vmem:[%s3472_s26 + $0xe0] sm:$0xff] }
 0x11e   : > { %1462 = vmatpush1.bf16.msra.mxu0 %v2767_v3  ;;  %v644_v3 = vld [vmem:[%s3472_s26 + $0xf0] sm:$0xff] }
 0x11f   : > { %1463 = vmatprep.subr.bf16.mxu0 %v2772_v4  ;;  %v1241_v4 = vpack.c.bf16 %v644_v3, %v642_v2 }
 0x122   : > { %1197 = vmatmul.mubr.bf16.gmra.mxu1 %v904_v43  ;;  %1464 = vmatpush2.bf16.msra.mxu0 %v2770_v5  ;;  %v628_v43 = vld [vmem:[%s3472_s26 + $0x70] sm:$0xff]  ;;  %v683_v5 = vlaneseq }
 0x123   : > { %1206 = vmatprep.mubr.bf16.mxu1 %v907_v44  ;;  %1465 = vmatprep.subr.bf16.mxu0 %v2775_v6  ;;  %v1233_v44 = vpack.c.bf16 %v628_v43, %v626_v42 }
 0x124   : > { %v684_v6 = vshrl.u32 %v683_v5, 7 }
 0x126   : > { %1466 = vmatpush2.bf16.msra.mxu0 %v2773_v7  ;;  %v3554_v7 = vsub.s32 0, %v684_v6 }
 0x127   : > { %1467 = vmatprep.subr.bf16.mxu0 %v2778_v8  ;;  %v942_v8 = vld [vmem:[%s3956_s7] sm:$0x3] }
 0x12a   : > { %1207 = vmatmul.mubr.bf16.gmra.mxu1 %v906_v49  ;;  %1468 = vmatpush2.bf16.msra.mxu0 %v2776_v9  ;;  %v632_v49 = vld [vmem:[%s3472_s26 + $0x90] sm:$0xff]  ;;  %v3559_v9 = vsub.s32 1, %v684_v6 }
 0x12b   : > { %1216 = vmatprep.mubr.bf16.mxu1 %v909_v50  ;;  %1469 = vmatprep.subr.bf16.mxu0 %v2781_v10  ;;  %v1235_v50 = vpack.c.bf16 %v632_v49, %v630_v48 }
 0x12e   : > { %1470 = vmatpush2.bf16.msra.mxu0 %v2779_v11  ;;  %v3562_v11 = vrot.slane %v942_v8, %v3554_v7 }
 0x12f   : > { %1471 = vmatprep.subr.bf16.mxu0 %v2784_v12 }
 0x132   : > { %1217 = vmatmul.mubr.bf16.gmra.mxu1 %v908_v53  ;;  %1472 = vmatpush2.bf16.msra.mxu0 %v2782_v13  ;;  %v1238_v53 = vpack.c.bf16 %v637_v52, %v635_v51  ;;  %v3565_v13 = vrot.slane %v942_v8, %v3559_v9 }
 0x133   : > { %1473 = vmatprep.subr.bf16.mxu0 %v2787_v14  ;;  %2459 = vmatprep.mubr.msk.bf16.mxu1 %vm3152_vm0, %v3151_v26 }
 0x136   : > { %1474 = vmatpush2.bf16.msra.mxu0 %v2785_v15 }
 0x137   : > { %1475 = vmatprep.subr.bf16.mxu0 %v2790_v16 }
 0x13a   : > { %1476 = vmatpush2.bf16.msra.mxu0 %v2788_v17 }
 0x13b   : > { %1477 = vmatprep.subr.bf16.mxu0 %v2793_v18 }
 0x13e   : > { %1478 = vmatpush2.bf16.msra.mxu0 %v2791_v19 }
 0x13f   : > { %2463 = vmatprep.subr.bf16.mxu0 %v3151_v26 }
 0x141   : > { %1480 = vmatmul.mubr.bf16.vlgmr.msra.gmra.mxu0 %v1227_v25 }
 0x142   : > { %1489 = vmatprep.mubr.bf16.mxu0 %v1230_v29 }
 0x149   : > { %1490 = vmatmul.mubr.bf16.gmra.mxu0 %v1229_v32 }
 0x14a   : > { %1499 = vmatprep.mubr.bf16.mxu0 %v1232_v35 }
 0x151   : > { %1500 = vmatmul.mubr.bf16.gmra.mxu0 %v1231_v38 }
 0x152   : > { %1509 = vmatprep.mubr.bf16.mxu0 %v1234_v41 }
 0x159   : > { %1510 = vmatmul.mubr.bf16.gmra.mxu0 %v1233_v44 }
 0x15a   : > { %1519 = vmatprep.mubr.bf16.mxu0 %v1236_v47 }
 0x161   : > { %1520 = vmatmul.mubr.bf16.gmra.mxu0 %v1235_v50 }
 0x162   : > { %1529 = vmatprep.mubr.bf16.mxu0 %v1238_v53 }
 0x169   : > { %1530 = vmatmul.mubr.bf16.gmra.mxu0 %v1237_v56 }
 0x16a   : > { %1539 = vmatprep.mubr.bf16.mxu0 %v1240_v59 }
 0x171   : > { %1540 = vmatmul.mubr.bf16.gmra.mxu0 %v1239_v62 }
 0x172   : > { %1549 = vmatprep.mubr.bf16.mxu0 %v1242_v1 }
 0x179   : > { %1550 = vmatmul.mubr.bf16.gmra.mxu0 %v1241_v4 }
 0x17a   : > { %2479 = vmatprep.mubr.msk.bf16.mxu0 %vm3152_vm0, %v3151_v26 }
 0x1ba   : > { %v1148_v10 = vpop.f32.mrf.mxu1 }
 0x1bb   : > { %v3568_v15 = vadd.f32 %v1148_v10, %v3562_v11 }
 0x1bc   : > { %v1150_v12 = vpop.f32.mrf.mxu1 }
 0x1bd   : > { %v3574_v18 = vadd.f32 %v1150_v12, %v3565_v13 }
 0x1be   : > { %v1152_v14 = vpop.f32.mrf.mxu1 }
 0x1bf   : > { %v3571_v16 = vadd.f32 %v1152_v14, %v3562_v11 }
 0x1c0   : > { %v1154_v17 = vpop.f32.mrf.mxu1 }
 0x1c1   : > { %v1562_v19 = vpack.c.bf16 %v3571_v16, %v3568_v15  ;;  %v3579_v20 = vadd.f32 %v1154_v17, %v3565_v13  ;;  %v3629_v52 = vpop.f32.mrf.mxu0 }
 0x1c2   : > { %v1158_v21 = vpop.f32.mrf.mxu1 }
 0x1c3   : > { %v1570_v22 = vpack.c.bf16 %v3579_v20, %v3574_v18  ;;  %v3584_v25 = vadd.f32 %v1158_v21, %v3562_v11  ;;  %v3633_v55 = vpop.f32.mrf.mxu0 }
 0x1c4   : > { %v1160_v23 = vpop.f32.mrf.mxu1 }
 0x1c5   : > { %v3590_v29 = vadd.f32 %v1160_v23, %v3565_v13  ;;  %v891_v57 = vpop.f32.mrf.mxu0 }
 0x1c6   : > { %v1162_v24 = vpop.f32.mrf.mxu1 }
 0x1c7   : > { %v3587_v27 = vadd.f32 %v1162_v24, %v3562_v11  ;;  %v892_v59 = vpop.f32.mrf.mxu0 }
 0x1c8   : > { %v1164_v28 = vpop.f32.mrf.mxu1 }
 0x1c9   : > { %v1563_v30 = vpack.c.bf16 %v3587_v27, %v3584_v25  ;;  %v3595_v31 = vadd.f32 %v1164_v28, %v3565_v13  ;;  %v1275_v25 = vld [vmem:[%s3958_s9] sm:$0x3] }
 0x1ca   : > { %v1168_v32 = vpop.f32.mrf.mxu1  ;;  %v3693_v27 = vrot.slane %v1275_v25, %v3554_v7 }
 0x1cb   : > { %v1571_v33 = vpack.c.bf16 %v3595_v31, %v3590_v29  ;;  %v3600_v36 = vadd.f32 %v1168_v32, %v3562_v11 }
 0x1cc   : > { %v1170_v34 = vpop.f32.mrf.mxu1 }
 0x1cd   : > { %v3606_v39 = vadd.f32 %v1170_v34, %v3565_v13 }
 0x1ce   : > { %v1172_v35 = vpop.f32.mrf.mxu1 }
 0x1cf   : > { %v3603_v37 = vadd.f32 %v1172_v35, %v3562_v11 }
 0x1d0   : > { %v1174_v38 = vpop.f32.mrf.mxu1 }
 0x1d1   : > { %v1564_v40 = vpack.c.bf16 %v3603_v37, %v3600_v36  ;;  %v3611_v41 = vadd.f32 %v1174_v38, %v3565_v13 }
 0x1d2   : > { %v1178_v42 = vpop.f32.mrf.mxu1 }
 0x1d3   : > { %v1572_v43 = vpack.c.bf16 %v3611_v41, %v3606_v39  ;;  %v3616_v46 = vadd.f32 %v1178_v42, %v3562_v11 }
 0x1d4   : > { %v1180_v44 = vpop.f32.mrf.mxu1 }
 0x1d5   : > { %v3622_v49 = vadd.f32 %v1180_v44, %v3565_v13 }
 0x1d6   : > { %v1182_v45 = vpop.f32.mrf.mxu1 }
 0x1d7   : > { %v3619_v47 = vadd.f32 %v1182_v45, %v3562_v11 }
 0x1d8   : > { %v1184_v48 = vpop.f32.mrf.mxu1 }
 0x1d9   : > { %v1565_v50 = vpack.c.bf16 %v3619_v47, %v3616_v46  ;;  %v3627_v51 = vadd.f32 %v1184_v48, %v3565_v13 }
 0x1da   : > { %v1188_v53 = vpop.f32.mrf.mxu1 }
 0x1db   : > { %v1573_v54 = vpack.c.bf16 %v3627_v51, %v3622_v49  ;;  %v1189_v57 = vadd.f32 %v1188_v53, %v3562_v11 }
 0x1dc   : > { %v1190_v56 = vpop.f32.mrf.mxu1 }
 0x1de   : > { %v1192_v58 = vpop.f32.mrf.mxu1 }
 0x1df   : > { %v1193_v51 = vadd.f32 %v1192_v58, %v3562_v11 }
 0x1e0   : > { %v1194_v60 = vpop.f32.mrf.mxu1 }
 0x1e1   : > { %v1195_v59 = vadd.f32 %v1194_v60, %v3565_v13 }
 0x1e2   : > { %v1198_v61 = vpop.f32.mrf.mxu1 }
 0x1e3   : > { %v1199_v45 = vadd.f32 %v1198_v61, %v3562_v11  ;;  %v1191_v61 = vadd.f32 %v1190_v56, %v3565_v13 }
 0x1e4   : > { %v1200_v62 = vpop.f32.mrf.mxu1 }
 0x1e5   : > { %v1201_v47 = vadd.f32 %v1200_v62, %v3565_v13 }
 0x1e6   : > { %v1202_v63 = vpop.f32.mrf.mxu1 }
 0x1e7   : > { %v1203_v44 = vadd.f32 %v1202_v63, %v3562_v11  ;;  %v1566_v63 = vpack.c.bf16 %v1193_v51, %v1189_v57 }
 0x1e8   : > { %v1204_v0 = vpop.f32.mrf.mxu1 }
 0x1e9   : > { %v1205_v46 = vadd.f32 %v1204_v0, %v3565_v13  ;;  %v1567_v48 = vpack.c.bf16 %v1203_v44, %v1199_v45  ;;  %v1574_v0 = vpack.c.bf16 %v1195_v59, %v1191_v61 }
 0x1ea   : > { %v1208_v1 = vpop.f32.mrf.mxu1 }
 0x1eb   : > { %v1209_v32 = vadd.f32 %v1208_v1, %v3562_v11  ;;  %v1575_v49 = vpack.c.bf16 %v1205_v46, %v1201_v47 }
 0x1ec   : > { %v1210_v2 = vpop.f32.mrf.mxu1 }
 0x1ed   : > { %v1211_v35 = vadd.f32 %v1210_v2, %v3565_v13 }
 0x1ee   : > { %v1212_v3 = vpop.f32.mrf.mxu1 }
 0x1ef   : > { %v1213_v28 = vadd.f32 %v1212_v3, %v3562_v11 }
 0x1f0   : > { %v1214_v4 = vpop.f32.mrf.mxu1 }
 0x1f1   : > { %v1215_v34 = vadd.f32 %v1214_v4, %v3565_v13  ;;  %v1568_v38 = vpack.c.bf16 %v1213_v28, %v1209_v32 }
 0x1f2   : > { %v1218_v5 = vpop.f32.mrf.mxu1 }
 0x1f3   : > { %v1219_v10 = vadd.f32 %v1218_v5, %v3562_v11  ;;  %v1576_v42 = vpack.c.bf16 %v1215_v34, %v1211_v35 }
 0x1f4   : > { %v1220_v6 = vpop.f32.mrf.mxu1 }
 0x1f5   : > { %v1221_v17 = vadd.f32 %v1220_v6, %v3565_v13 }
 0x1f6   : > { %v1222_v8 = vpop.f32.mrf.mxu1 }
 0x1f7   : > { %v1223_v12 = vadd.f32 %v1222_v8, %v3562_v11  ;;  %v681_v11 = vld [vmem:[%s3954_s5] sm:$0x3] }
 0x1f8   : > { %v1224_v14 = vpop.f32.mrf.mxu1  ;;  %v690_v37 = vrot.slane %v681_v11, %v3559_v9 }
 0x1f9   : > { %v1569_v21 = vpack.c.bf16 %v1223_v12, %v1219_v10  ;;  %v1225_v23 = vadd.f32 %v1224_v14, %v3565_v13  ;;  %v686_v13 = vrot.slane %v681_v11, %v3554_v7 }
 0x1fb   : > { %v1577_v24 = vpack.c.bf16 %v1225_v23, %v1221_v17  ;;  %2444 = vmatpush3.bf16.xpose.msra.mxu1 %v1569_v21  ;;  %v888_v36 = vadd.f32 %v3629_v52, %v686_v13 }
 0x1fc   : > { %2445 = vmatprep.subr.bf16.mxu1 %v3151_v26 }
 0x1fd   : > { %2464 = vmatpush3.bf16.xpose.msra.mxu0 %v1577_v24  ;;  %v1560_v29 = vpack.c.bf16 %v888_v36, %v888_v36 }
 0x1fe   : > { %2465 = vmatprep.subr.bf16.mxu0 %v3151_v26 }
 0x201   : > { %v1481_v31 = vpop.f32.mrf.mxu0 }
 0x203   : > { %2446 = vmatpush3.bf16.xpose.msra.mxu1 %v1568_v38  ;;  %v1483_v39 = vpop.f32.mrf.mxu0 }
 0x204   : > { %2447 = vmatprep.subr.bf16.mxu1 %v3151_v26 }
 0x205   : > { %2466 = vmatpush3.bf16.xpose.msra.mxu0 %v1576_v42  ;;  %v1485_v16 = vpop.f32.mrf.mxu0 }
 0x206   : > { %2467 = vmatprep.subr.bf16.mxu0 %v3151_v26 }
 0x207   : > { %v1487_v20 = vpop.f32.mrf.mxu0 }
 0x20b   : > { %2448 = vmatpush3.bf16.xpose.msra.mxu1 %v1567_v48 }
 0x20c   : > { %2449 = vmatprep.subr.bf16.mxu1 %v3151_v26 }
 0x20d   : > { %2468 = vmatpush3.bf16.xpose.msra.mxu0 %v1575_v49 }
 0x20e   : > { %2469 = vmatprep.subr.bf16.mxu0 %v3151_v26 }
 0x213   : > { %2450 = vmatpush3.bf16.xpose.msra.mxu1 %v1566_v63 }
 0x214   : > { %2451 = vmatprep.subr.bf16.mxu1 %v3151_v26 }
 0x215   : > { %2470 = vmatpush3.bf16.xpose.msra.mxu0 %v1574_v0 }
 0x216   : > { %2471 = vmatprep.subr.bf16.mxu0 %v3151_v26 }
 0x21b   : > { %2452 = vmatpush3.bf16.xpose.msra.mxu1 %v1565_v50 }
 0x21c   : > { %2453 = vmatprep.subr.bf16.mxu1 %v3151_v26 }
 0x21d   : > { %2472 = vmatpush3.bf16.xpose.msra.mxu0 %v1573_v54 }
 0x21e   : > { %2473 = vmatprep.subr.bf16.mxu0 %v3151_v26 }
 0x223   : > { %2454 = vmatpush3.bf16.xpose.msra.mxu1 %v1564_v40  ;;  %v3700_v40 = vadd.f32 %v1481_v31, %v3693_v27 }
 0x224   : > { %2455 = vmatprep.subr.bf16.mxu1 %v3151_v26 }
 0x225   : > { %2474 = vmatpush3.bf16.xpose.msra.mxu0 %v1572_v43  ;;  %v1491_v43 = vpop.f32.mrf.mxu0 }
 0x226   : > { %2475 = vmatprep.subr.bf16.mxu0 %v3151_v26  ;;  %v3716_v53 = vadd.f32 %v1491_v43, %v3693_v27 }
 0x227   : > { %v1493_v52 = vpop.f32.mrf.mxu0 }
 0x229   : > { %v1495_v54 = vpop.f32.mrf.mxu0 }
 0x22a   : > { %v3722_v56 = vadd.f32 %v1495_v54, %v3693_v27 }
 0x22b   : > { %2456 = vmatpush3.bf16.xpose.msra.mxu1 %v1563_v30  ;;  %v890_v30 = vadd.f32 %v3633_v55, %v690_v37  ;;  %v1497_v58 = vpop.f32.mrf.mxu0 }
 0x22c   : > { %2457 = vmatprep.subr.bf16.mxu1 %v3151_v26  ;;  %v1579_v60 = vpack.c.bf16 %v3722_v56, %v3716_v53 }
 0x22d   : > { %2476 = vmatpush3.bf16.xpose.msra.mxu0 %v1571_v33  ;;  %v3697_v33 = vrot.slane %v1275_v25, %v3559_v9  ;;  %v1561_v15 = vpack.c.bf16 %v890_v30, %v890_v30  ;;  %v1501_v1 = vpop.f32.mrf.mxu0 }
 0x22e   : > { %2477 = vmatprep.subr.bf16.mxu0 %v3151_v26  ;;  %v3732_v4 = vadd.f32 %v1501_v1, %v3693_v27 }
 0x22f   : > { %v3703_v18 = vadd.f32 %v1483_v39, %v3697_v33  ;;  %v3711_v41 = vadd.f32 %v1487_v20, %v3697_v33  ;;  %v3719_v55 = vadd.f32 %v1493_v52, %v3697_v33  ;;  %v3727_v62 = vadd.f32 %v1497_v58, %v3697_v33  ;;  %v1503_v3 = vpop.f32.mrf.mxu0 }
 0x230   : > { %v3735_v6 = vadd.f32 %v1503_v3, %v3697_v33 }
 0x231   : > { %v1586_v50 = vpack.c.bf16 %v3711_v41, %v3703_v18  ;;  %v1587_v2 = vpack.c.bf16 %v3727_v62, %v3719_v55  ;;  %v1505_v5 = vpop.f32.mrf.mxu0 }
 0x232   : > { %v3738_v8 = vadd.f32 %v1505_v5, %v3693_v27 }
 0x233   : > { %2458 = vmatpush3.bf16.xpose.msra.mxu1 %v1562_v19  ;;  %v3706_v19 = vadd.f32 %v1485_v16, %v3693_v27  ;;  %v1507_v10 = vpop.f32.mrf.mxu0 }
 0x234   : > { %v1580_v12 = vpack.c.bf16 %v3738_v8, %v3732_v4  ;;  %v3743_v14 = vadd.f32 %v1507_v10, %v3697_v33 }
 0x235   : > { %2478 = vmatpush3.bf16.xpose.msra.mxu0 %v1570_v22  ;;  %v1578_v22 = vpack.c.bf16 %v3706_v19, %v3700_v40  ;;  %v1511_v17 = vpop.f32.mrf.mxu0 }
 0x236   : > { %v1588_v21 = vpack.c.bf16 %v3743_v14, %v3735_v6  ;;  %v3748_v24 = vadd.f32 %v1511_v17, %v3693_v27 }
 0x237   : > { %v1513_v23 = vpop.f32.mrf.mxu0 }
 0x238   : > { %v3751_v32 = vadd.f32 %v1513_v23, %v3697_v33 }
 0x239   : > { %v1515_v28 = vpop.f32.mrf.mxu0 }
 0x23a   : > { %2460 = vmatmul.mubr.bf16.vlgmr.msra.gmra.mxu1 %v1560_v29  ;;  %v3754_v34 = vadd.f32 %v1515_v28, %v3693_v27 }
 0x23b   : > { %v1517_v35 = vpop.f32.mrf.mxu0 }
 0x23c   : > { %2480 = vmatmul.mubr.bf16.vlgmr.msra.gmra.mxu0 %v1561_v15  ;;  %v1581_v38 = vpack.c.bf16 %v3754_v34, %v3748_v24  ;;  %v3759_v42 = vadd.f32 %v1517_v35, %v3697_v33 }
 0x23d   : > { %v1521_v44 = vpop.f32.mrf.mxu0 }
 0x23e   : > { %v1589_v45 = vpack.c.bf16 %v3759_v42, %v3751_v32  ;;  %v3764_v47 = vadd.f32 %v1521_v44, %v3693_v27 }
 0x23f   : > { %v1523_v46 = vpop.f32.mrf.mxu0 }
 0x240   : > { %v3767_v49 = vadd.f32 %v1523_v46, %v3697_v33 }
 0x241   : > { %v1525_v48 = vpop.f32.mrf.mxu0 }
 0x242   : > { %v3770_v51 = vadd.f32 %v1525_v48, %v3693_v27 }
 0x243   : > { %v1527_v57 = vpop.f32.mrf.mxu0 }
 0x244   : > { %v1582_v59 = vpack.c.bf16 %v3770_v51, %v3764_v47  ;;  %v3775_v61 = vadd.f32 %v1527_v57, %v3697_v33 }
 0x245   : > { %v1531_v63 = vpop.f32.mrf.mxu0 }
 0x246   : > { %v1590_v0 = vpack.c.bf16 %v3775_v61, %v3767_v49  ;;  %v3780_v13 = vadd.f32 %v1531_v63, %v3693_v27 }
 0x247   : > { %v1533_v11 = vpop.f32.mrf.mxu0 }
 0x248   : > { %v3783_v37 = vadd.f32 %v1533_v11, %v3697_v33  ;;  %v646_v11 = vld [vmem:[%s578_s20] sm:$0x1] }
 0x249   : > { %v1535_v36 = vpop.f32.mrf.mxu0  ;;  %vm1676_vm1 = vcmp.eq.f32.partialorder %v646_v11, 0.0 }
 0x24a   : > { %v3786_v25 = vadd.f32 %v1535_v36, %v3693_v27  ;;  %v1677_v36 = vsel %vm1676_vm1, -1e+30, %v3151_v26 }
 0x24b   : > { %v1537_v29 = vpop.f32.mrf.mxu0 }
 0x24c   : > { %v1583_v30 = vpack.c.bf16 %v3786_v25, %v3780_v13  ;;  %v3791_v31 = vadd.f32 %v1537_v29, %v3697_v33 }
 0x24d   : > { %v1541_v39 = vpop.f32.mrf.mxu0 }
 0x24e   : > { %v1591_v15 = vpack.c.bf16 %v3791_v31, %v3783_v37  ;;  %v3796_v20 = vadd.f32 %v1541_v39, %v3693_v27 }
 0x24f   : > { %v1543_v16 = vpop.f32.mrf.mxu0 }
 0x250   : > { %v3799_v52 = vadd.f32 %v1543_v16, %v3697_v33 }
 0x251   : > { %v1545_v43 = vpop.f32.mrf.mxu0 }
 0x252   : > { %v3802_v54 = vadd.f32 %v1545_v43, %v3693_v27 }
 0x253   : > { %v1547_v58 = vpop.f32.mrf.mxu0 }
 0x254   : > { %v1584_v1 = vpack.c.bf16 %v3802_v54, %v3796_v20  ;;  %v3807_v3 = vadd.f32 %v1547_v58, %v3697_v33 }
 0x255   : > { %v1551_v5 = vpop.f32.mrf.mxu0 }
 0x256   : > { %v1592_v10 = vpack.c.bf16 %v3807_v3, %v3799_v52  ;;  %v1552_v23 = vadd.f32 %v1551_v5, %v3693_v27 }
 0x257   : > { %v1553_v17 = vpop.f32.mrf.mxu0 }
 0x258   : > { %v3813_v35 = vadd.f32 %v1553_v17, %v3697_v33 }
 0x259   : > { %v1555_v28 = vpop.f32.mrf.mxu0 }
 0x25a   : > { %v1556_v44 = vadd.f32 %v1555_v28, %v3693_v27  ;;  %v1682_v27 = vrot.slane %v1677_v36, %v3554_v7 }
 0x25b   : > { %v1557_v46 = vpop.f32.mrf.mxu0 }
 0x25c   : > { %v1585_v48 = vpack.c.bf16 %v1556_v44, %v1552_v23  ;;  %v3817_v57 = vadd.f32 %v1557_v46, %v3697_v33 }
 0x25e   : > { %v1593_v63 = vpack.c.bf16 %v3817_v57, %v3813_v35 }
 0x2fa   : > { %v1628_v29 = vpop.f32.mrf.mxu1 }
 0x2fb   : > { %v1674_v39 = vmul.f32 0.088388346, %v1628_v29 }
 0x2fc   : > { %v2461_v33 = vpop.f32.mrf.mxu1  ;;  %v1668_v16 = vpop.f32.mrf.mxu0 }
 0x2fd   : > { %v1684_v20 = vadd.f32 %v1682_v27, %v1674_v39   ;;  %v1675_v43 = vmul.f32 0.088388346, %v1668_v16 }
 0x2fe   : > { %v1631_v54 = vpop.f32.mrf.mxu1  ;;  %v2481_v58 = vpop.f32.mrf.mxu0 }
 0x2ff   : > { %v1685_v5 = vadd.f32 %v1682_v27, %v1675_v43   ;;  %v3132_v46 = vmov %v1684_v20  }
 0x300   : > { %v2462_v17 = vpop.f32.mrf.mxu1  ;;  %v1671_v23 = vpop.f32.mrf.mxu0 }
 0x301   : > { %v3128_v44 = vmov %v1685_v5  }
 0x302   : > { %v2482_v28 = vpop.f32.mrf.mxu0 }
 0x303 LB: >> { %1694 = vmax.xlane.f32.xlu0 %v3134_v46  ;;  %s1691_s4 = sadd.s32 1, %s3138_s4   ;;  %s3138_s4 = sphi %s3136_s4, %s1691_s4   ;;  %v3134_v46 = vphi %v3132_v46, %v3133_v46   ;;  %v3130_v44 = vphi %v3128_v44, %v3129_v44  }
 0x304   : >> { %p1688_p8 = scmp.ge.s32.totalorder %s1691_s4, 31  }
 0x305   : > { %2483 = vmatprep.subr.bf16.mxu1 (%p1688_p8), %v3151_v26  ;;  %2499 = vmatprep.mubr.msk.bf16.mxu1 (%p1688_p8), %vm3152_vm0, %v3151_v26  ;;  %v2796_v51 = vld [vmem:[#allocation13 + $0x70] ss:$8 sps:$4 sm:$0xff] (%p1688_p8)   ;;  %v2799_v13 = vld [vmem:[#allocation13 + $0x60] ss:$8 sps:$4 sm:$0xff] (%p1688_p8)   ;;  %v2800_v25 = vld [vmem:[#allocation13 + $0x54] ss:$8 sps:$4 sm:$0xff] (%p1688_p8)  }
 0x306   : > { %2484 = vmatpush3.bf16.msra.mxu1 (%p1688_p8), %v1585_v48  ;;  %v2805_v48 = vld [vmem:[#allocation13 + $0x40] ss:$8 sps:$4 sm:$0xff] (%p1688_p8)   ;;  %v2806_v39 = vld [vmem:[#allocation13 + $0x34] ss:$8 sps:$4 sm:$0xff] (%p1688_p8)   ;;  %v2808_v33 = vld [vmem:[#allocation13 + $0x30] ss:$8 sps:$4 sm:$0xff] (%p1688_p8)  }
 0x307   : >> { %1696 = vmax.xlane.f32.xlu0 %v3130_v44  ;;  %2485 = vmatprep.subr.bf16.mxu1 (%p1688_p8), %v3151_v26  ;;  %v2809_v16 = vld [vmem:[#allocation13 + $0x24] ss:$8 sps:$4 sm:$0xff] (%p1688_p8)   ;;  %v2812_v43 = vld [vmem:[#allocation13 + $0x14] ss:$8 sps:$4 sm:$0xff] (%p1688_p8)   ;;  %v2814_v54 = vld [vmem:[#allocation13 + $0x10] ss:$8 sps:$4 sm:$0xff] (%p1688_p8)  }
 0x308   : > { %v2815_v58 = vld [vmem:[#allocation13 + $0x4] ss:$8 sps:$4 sm:$0xff] (%p1688_p8)   ;;  %v2817_v42 = vld [vmem:[#allocation13] ss:$8 sps:$4 sm:$0xff] (%p1688_p8)   ;;  %v2818_v6 = vld [vmem:[#allocation13 + $0xf4] ss:$8 sps:$4 sm:$0xff] (%p1688_p8)  }
 0x309   : > { %v2820_v14 = vld [vmem:[#allocation13 + $0xf0] ss:$8 sps:$4 sm:$0xff] (%p1688_p8)   ;;  %v2824_v61 = vld [vmem:[#allocation13 + $0xd4] ss:$8 sps:$4 sm:$0xff] (%p1688_p8)   ;;  %v2829_v62 = vld [vmem:[#allocation13 + $0xc0] ss:$8 sps:$4 sm:$0xff] (%p1688_p8)  }
 0x30a   : > { %2486 = vmatpush3.bf16.msra.mxu1 (%p1688_p8), %v1584_v1  ;;  %v2803_v1 = vld [vmem:[#allocation13 + $0x44] ss:$8 sps:$4 sm:$0xff] (%p1688_p8)   ;;  %v2826_v55 = vld [vmem:[#allocation13 + $0xd0] ss:$8 sps:$4 sm:$0xff] (%p1688_p8)   ;;  %v2830_v18 = vld [vmem:[#allocation13 + $0xb4] ss:$8 sps:$4 sm:$0xff] (%p1688_p8)  }
 0x30b   : > { %2487 = vmatprep.subr.bf16.mxu1 (%p1688_p8), %v3151_v26  ;;  %v2832_v41 = vld [vmem:[#allocation13 + $0xb0] ss:$8 sps:$4 sm:$0xff] (%p1688_p8)   ;;  %v2841_v52 = vld [vmem:[#allocation13 + $0x80] ss:$8 sps:$4 sm:$0xff] (%p1688_p8)   ;;  %s4025_s19 = sld [smem:[#allocation31_spill]] (%p1688_p8)  ;;  %s2406_s23 = sshll.u32 (%p1688_p8), %s3240_s25, 8 }
 0x30c   : > { %v2838_v31 = vld [vmem:[#allocation13 + $0x90] ss:$8 sps:$4 sm:$0xff] (%p1688_p8)   ;;  %s4026_s1 = sld [smem:[#allocation24_spill]] (%p1688_p8)  ;;  %s2074_s29 = sshll.u32 (%p1688_p8), %s3830_s11, 4  ;;  %s3907_s29 = int_to_ptr.vmem [resolvable:$true] %s2074_s29 }
 0x30d   : > { %s4027_s27 = sld [smem:[#allocation32_spill]] (%p1688_p8)  ;;  %s2060_s30 = scalar_lea.sflag (%p1688_p8), [#allocation4], %s3452_s21 }
 0x30e   : > { %2488 = vmatpush3.bf16.msra.mxu1 (%p1688_p8), %v1583_v30  ;;  %v2802_v30 = vld [vmem:[#allocation13 + $0x50] ss:$8 sps:$4 sm:$0xff] (%p1688_p8)   ;;  %s3038_s25 = scalar_lea.vmem (%p1688_p8), %s3907_s29, 256  ;;  %s3153_s14 = smov (%p1688_p8), [#allocation14]  }
 0x30f   : > { %2489 = vmatprep.subr.bf16.mxu1 (%p1688_p8), %v3151_v26  ;;  %p3039_p11 = scmp.ne.s32.totalorder (%p1688_p8), %s3907_s29, %s3038_s25  ;;  %s3042_s3 = sshll.u32 (%p1688_p8), %s3153_s14, 4  ;;  %s3043_s3 = int_to_ptr.vmem [resolvable:$false] %s3042_s3 }
 0x310   : > { %s3044_s13 = scalar_lea.vmem (%p1688_p8), %s3043_s3, 512  ;;  %p3045_p3 = scmp.lt.s32.totalorder (%p1688_p8), %s3907_s29, %s3043_s3 }
 0x311   : > { %p3046_p4 = scmp.lt.s32.totalorder (%p1688_p8), %s3044_s13, %s3038_s25 }
 0x312   : > { %2490 = vmatpush3.bf16.msra.mxu1 (%p1688_p8), %v1582_v59  ;;  %v2797_v59 = vld [vmem:[#allocation13 + $0x64] ss:$8 sps:$4 sm:$0xff] (%p1688_p8)   ;;  %p4028_p12 = scmp.ne.s32.totalorder (%p1688_p8), %s4026_s1, 0 }
 0x313   : > { %2491 = vmatprep.subr.bf16.mxu1 (%p1688_p8), %v3151_v26  ;;  %s3905_s6 = scalar_lea.hbm (%p1688_p8), %s4027_s27, %s2406_s23  ;;  %p3047_p13 = por (%p1688_p8), %p3046_p4, %p3045_p3 }
 0x314   : > { %p3040_p10 = pnand (%p1688_p8), %p3039_p11, %p4028_p12 }
 0x316   : > { %2492 = vmatpush3.bf16.msra.mxu1 (%p1688_p8), %v1581_v38  ;;  %p3041_p5 = pneg (%p1688_p8), %p3040_p10 }
 0x317   : > { %2493 = vmatprep.subr.bf16.mxu1 (%p1688_p8), %v3151_v26 }
 0x318   : > { %p3048_p7 = pnand (%p1688_p8), %p3047_p13, %p3041_p5 }
 0x31a   : > { %2494 = vmatpush3.bf16.msra.mxu1 (%p1688_p8), %v1580_v12 }
 0x31b   : > { %2495 = vmatprep.subr.bf16.mxu1 (%p1688_p8), %v3151_v26 }
 0x31e   : > { %2496 = vmatpush3.bf16.msra.mxu1 (%p1688_p8), %v1579_v60 }
 0x31f   : > { %2497 = vmatprep.subr.bf16.mxu1 (%p1688_p8), %v3151_v26 }
 0x322   : > { %2498 = vmatpush3.bf16.msra.mxu1 (%p1688_p8), %v1578_v22  ;;  %v2794_v22 = vld [vmem:[#allocation13 + $0x74] ss:$8 sps:$4 sm:$0xff] (%p1688_p8)  }
 0x323   : > { %2503 = vmatprep.subr.bf16.mxu1 (%p1688_p8), %v3151_v26  ;;  %2016 = vmatprep.subr.bf16.mxu0 (%p1688_p8), %v2794_v22 }
 0x324   : > { %2017 = vmatpush1.bf16.msra.mxu0 (%p1688_p8), %v2796_v51 }
 0x325   : > { %2018 = vmatprep.subr.bf16.mxu0 (%p1688_p8), %v2797_v59 }
 0x328   : > { %2019 = vmatpush1.bf16.msra.mxu0 (%p1688_p8), %v2799_v13 }
 0x329   : > { %2020 = vmatprep.subr.bf16.mxu0 (%p1688_p8), %v2800_v25 }
 0x32c   : > { %2021 = vmatpush1.bf16.msra.mxu0 (%p1688_p8), %v2802_v30 }
 0x32d   : > { %2022 = vmatprep.subr.bf16.mxu0 (%p1688_p8), %v2803_v1 }
 0x330   : > { %2023 = vmatpush1.bf16.msra.mxu0 (%p1688_p8), %v2805_v48 }
 0x331   : > { %2024 = vmatprep.subr.bf16.mxu0 (%p1688_p8), %v2806_v39 }
 0x334   : > { %2025 = vmatpush1.bf16.msra.mxu0 (%p1688_p8), %v2808_v33 }
 0x335   : > { %2026 = vmatprep.subr.bf16.mxu0 (%p1688_p8), %v2809_v16 }
 0x38c   : >> { %v1695_v11 = vpop.xlane.xlu0 %1694 }
 0x38d   : >> { %vm1698_vm2 = vcmp.ge.f32.partialorder %v3134_v46, %v1695_v11 }
 0x38e   : >> { %v1700_v36 = vsel %vm1698_vm2, -1e+30, %v3134_v46  }
 0x38f   : >> { %v3133_v46 = vmov %v1700_v36   ;;  %1690 = sbr.rel (!%p1688_p8) target bundleno = 771 (0x303), region = 163  ;;  %1702 = vmax.xlane.f32.xlu0 (%p1688_p8), %v1700_v36 }
 0x390   : >> { %v1697_v27 = vpop.xlane.xlu0 %1696 }
 0x391   : >> { %vm1699_vm3 = vcmp.ge.f32.partialorder %v3130_v44, %v1697_v27 }
 0x392   : >> { %v1701_v29 = vsel %vm1699_vm3, -1e+30, %v3130_v44  }
 0x393   : >> { %v3129_v44 = vmov %v1701_v29   ;;  %1704 = vmax.xlane.f32.xlu0 (%p1688_p8), %v1701_v29 }
 0x418   : > { %v1703_v24 = vpop.xlane.xlu0 %1702 }
 0x419   : > { %vm1706_vm4 = vcmp.ge.f32.partialorder %v1684_v20, %v1703_v24  ;;  %v1844_v24 = vld [vmem:[%s4025_s19] sm:$0x3] }
 0x41a   : > { %v1708_v34 = vsel %vm1706_vm4, %v1684_v20, -1e+30  ;;  %v2811_v20 = vld [vmem:[#allocation13 + $0x20] ss:$8 sps:$4 sm:$0xff]  }
 0x41b   : > { %1710 = vmax.xlane.f32.xlu1 %v1708_v34  ;;  %2027 = vmatpush1.bf16.msra.mxu0 %v2811_v20 }
 0x41c   : > { %v1705_v4 = vpop.xlane.xlu0 %1704  ;;  %2028 = vmatprep.subr.bf16.mxu0 %v2812_v43 }
 0x41d   : > { %vm1707_vm5 = vcmp.ge.f32.partialorder %v1685_v5, %v1705_v4  ;;  %v1853_v4 = vrot.slane %v1844_v24, %v3559_v9 }
 0x41e   : > { %v1709_v8 = vsel %vm1707_vm5, %v1685_v5, -1e+30 }
 0x41f   : > { %1712 = vmax.xlane.f32.xlu1 %v1709_v8  ;;  %2029 = vmatpush1.bf16.msra.mxu0 %v2814_v54 }
 0x420   : > { %2030 = vmatprep.subr.bf16.mxu0 %v2815_v58 }
 0x423   : > { %2031 = vmatpush1.bf16.msra.mxu0 %v2817_v42 }
 0x424   : > { %2032 = vmatprep.subr.bf16.mxu0 %v2818_v6 }
 0x427   : > { %2033 = vmatpush2.bf16.msra.mxu0 %v2820_v14 }
 0x4a4   : > { %v1711_v12 = vpop.xlane.xlu1 %1710 }
 0x4a5   : > { %v1714_v38 = vsub.f32 %v1708_v34, %v1711_v12  ;;  %v1849_v34 = vrot.slane %v1844_v24, %v3554_v7 }
 0x4a7   : > { %v1716_v53 = vmul.f32 1.442695, %v1714_v38 }
 0x4a8   : > { %v1713_v56 = vpop.xlane.xlu1 %1712 }
 0x4a9   : > { %2842 = vpow2.f32 %v1716_v53  ;;  %v1715_v60 = vsub.f32 %v1709_v8, %v1713_v56 }
 0x4ab   : > { %v1718_v47 = vmul.f32 1.442695, %v1715_v60 }
 0x4ad   : > { %2844 = vpow2.f32 %v1718_v47 }
 0x4b6   : > { %v2843_v40 = vpop.eup %2842 }
 0x4b7   : > { %1720 = vadd.xlane.f32.xlu0 %v2843_v40 }
 0x4ba   : > { %v2845_v19 = vpop.eup %2844 }
 0x4bb   : > { %1722 = vadd.xlane.f32.xlu1 %v2845_v19 }
 0x540   : > { %v1721_v5 = vpop.xlane.xlu0 %1720 }
 0x541   : > { %2846 = vrcp.f32 %v1721_v5 }
 0x544   : > { %v1723_v44 = vpop.xlane.xlu1 %1722 }
 0x545   : > { %2848 = vrcp.f32 %v1723_v44 }
 0x54e   : > { %v2847_v17 = vpop.eup %2846 }
 0x54f   : > { %v1726_v23 = vmul.f32 %v2847_v17, %v2843_v40 }
 0x551   : > { %v1728_v28 = vpack.c.bf16 %v1726_v23, %v1726_v23 }
 0x552   : > { %v2849_v37 = vpop.eup %2848 }
 0x553   : > { %2500 = vmatmul.mubr.bf16.vlgmr.msra.gmra.mxu1 %v1728_v28  ;;  %v1727_v49 = vmul.f32 %v2849_v37, %v2845_v19 }
 0x554   : > { %2504 = vmatpush3.bf16.msra.mxu1 %v1593_v63  ;;  %2519 = vmatprep.mubr.msk.bf16.mxu1 %vm3152_vm0, %v3151_v26 }
 0x555   : > { %2505 = vmatprep.subr.bf16.mxu1 %v3151_v26  ;;  %v1729_v32 = vpack.c.bf16 %v1727_v49, %v1727_v49 }
 0x558   : > { %2506 = vmatpush3.bf16.msra.mxu1 %v1592_v10 }
 0x559   : > { %2507 = vmatprep.subr.bf16.mxu1 %v3151_v26 }
 0x55c   : > { %2508 = vmatpush3.bf16.msra.mxu1 %v1591_v15  ;;  %v2839_v15 = vld [vmem:[#allocation13 + $0x84] ss:$8 sps:$4 sm:$0xff]  }
 0x55d   : > { %2509 = vmatprep.subr.bf16.mxu1 %v3151_v26 }
 0x560   : > { %2510 = vmatpush3.bf16.msra.mxu1 %v1590_v0  ;;  %v2836_v0 = vld [vmem:[#allocation13 + $0x94] ss:$8 sps:$4 sm:$0xff]  }
 0x561   : > { %2511 = vmatprep.subr.bf16.mxu1 %v3151_v26 }
 0x564   : > { %2512 = vmatpush3.bf16.msra.mxu1 %v1589_v45  ;;  %v2823_v45 = vld [vmem:[#allocation13 + $0xe0] ss:$8 sps:$4 sm:$0xff]  }
 0x565   : > { %2513 = vmatprep.subr.bf16.mxu1 %v3151_v26 }
 0x568   : > { %2514 = vmatpush3.bf16.msra.mxu1 %v1588_v21  ;;  %v2821_v21 = vld [vmem:[#allocation13 + $0xe4] ss:$8 sps:$4 sm:$0xff]  }
 0x569   : > { %2515 = vmatprep.subr.bf16.mxu1 %v3151_v26  ;;  %2034 = vmatprep.subr.bf16.mxu0 %v2821_v21 }
 0x56a   : > { %2035 = vmatpush2.bf16.msra.mxu0 %v2823_v45 }
 0x56b   : > { %2036 = vmatprep.subr.bf16.mxu0 %v2824_v61 }
 0x56c   : > { %2516 = vmatpush3.bf16.msra.mxu1 %v1587_v2  ;;  %v2835_v2 = vld [vmem:[#allocation13 + $0xa0] ss:$8 sps:$4 sm:$0xff]  }
 0x56d   : > { %2517 = vmatprep.subr.bf16.mxu1 %v3151_v26  ;;  %v2827_v26 = vld [vmem:[#allocation13 + $0xc4] ss:$8 sps:$4 sm:$0xff]  }
 0x56e   : > { %2037 = vmatpush2.bf16.msra.mxu0 %v2826_v55 }
 0x56f   : > { %2038 = vmatprep.subr.bf16.mxu0 %v2827_v26 }
 0x570   : > { %2518 = vmatpush3.bf16.msra.mxu1 %v1586_v50  ;;  %v2833_v50 = vld [vmem:[#allocation13 + $0xa4] ss:$8 sps:$4 sm:$0xff]  }
 0x572   : > { %2039 = vmatpush2.bf16.msra.mxu0 %v2829_v62 }
 0x573   : > { %2520 = vmatmul.mubr.bf16.vlgmr.msra.gmra.mxu1 %v1729_v32  ;;  %2040 = vmatprep.subr.bf16.mxu0 %v2830_v18 }
 0x576   : > { %2041 = vmatpush2.bf16.msra.mxu0 %v2832_v41 }
 0x577   : > { %2042 = vmatprep.subr.bf16.mxu0 %v2833_v50 }
 0x57a   : > { %2043 = vmatpush2.bf16.msra.mxu0 %v2835_v2 }
 0x57b   : > { %2044 = vmatprep.subr.bf16.mxu0 %v2836_v0 }
 0x57e   : > { %2045 = vmatpush2.bf16.msra.mxu0 %v2838_v31 }
 0x57f   : > { %2046 = vmatprep.subr.bf16.mxu0 %v2839_v15 }
 0x582   : > { %2047 = vmatpush2.bf16.msra.mxu0 %v2841_v52 }
 0x613   : > { %v1764_v3 = vpop.f32.mrf.mxu1 }
 0x614   : > { %v1810_v11 = vpack.c.bf16 %v1764_v3, %v1764_v3 }
 0x615   : > { %v2501_v10 = vpop.f32.mrf.mxu1 }
 0x617   : > { %v1767_v35 = vpop.f32.mrf.mxu1 }
 0x619   : > { %v2502_v57 = vpop.f32.mrf.mxu1 }
 0x633   : > { %v1804_v63 = vpop.f32.mrf.mxu1 }
 0x634   : > { %v1811_v46 = vpack.c.bf16 %v1804_v63, %v1804_v63 }
 0x635   : > { %v2521_v36 = vpop.f32.mrf.mxu1 }
 0x636   : > { %2048 = vmatprep.mubr.bf16.mxu0 %v1811_v46 }
 0x637   : > { %v1807_v27 = vpop.f32.mrf.mxu1  ;;  %2049 = vmatmul.mubr.bf16.vlgmr.msra.gmra.mxu0 %v1810_v11 }
 0x639   : > { %v2522_v29 = vpop.f32.mrf.mxu1 }
 0x6f7   : > { %v2050_v8 = vpop.f32.mrf.mxu0 }
 0x6f8   : > { %v2051_v12 = vadd.f32 %v2050_v8, %v1849_v34 }
 0x6f9   : > { %v2052_v38 = vpop.f32.mrf.mxu0 }
 0x6fa   : > { %2057 = vst [vmem:[%s3830_s11] sm:$0xff] %v2051_v12  ;;  %v2053_v53 = vadd.f32 %v2052_v38, %v1853_v4 }
 0x6fb   : > { %v2054_v7 = vpop.f32.mrf.mxu0 }
 0x6fc   : > { %2058 = vst [vmem:[%s3830_s11 + $0x8] sm:$0xff] %v2053_v53 }
 0x6fd   : > { %v2055_v9 = vpop.f32.mrf.mxu0 }
 0x6fe   : > { %3051 = shalt.err (!%p3048_p7)
}
 0x6ff   : > { %s3052_s15 = scalar_lea.hbm %s3905_s6, 256  ;;  %s3056_s18 = scalar_lea.hbm %s4027_s27, 512 }
 0x700   : > { %p3053_p9 = scmp.ne.s32.totalorder %s3905_s6, %s3052_s15  ;;  %p3057_p1 = scmp.lt.s32.totalorder %s3905_s6, %s4027_s27 }
 0x701   : > { %p3058_p6 = scmp.lt.s32.totalorder %s3056_s18, %s3052_s15 }
 0x702   : > { %p3054_p2 = pnand %p3053_p9, %p4028_p12 }
 0x703   : > { %p3059_p8 = por %p3058_p6, %p3057_p1 }
 0x704   : > { %p3055_p0 = pneg %p3054_p2 }
 0x706   : > { %p3060_p11 = pnand %p3059_p8, %p3055_p0 }
 0x708   : > { %3063 = shalt.err (!%p3060_p11)
}
 0x709   : > { %2545 = dma.vmem_to_hbm [thread:$0]  (%p4028_p12), %s3907_s29, 256, %s3905_s6, %s2060_s30  }
 0x70a PF: > { %s4029_s11 = sld [smem:[#allocation20_spill]]  ;;  %p4032_p5 = scmp.ge.s32.totalorder %s3126_s24, 2 }
 0x70b   : > { %s4030_s4 = sld [smem:[#allocation22_spill]] }
 0x710   : > { %s2086_s17 = sand.u32 1, %s4029_s11  }
 0x711   : > { %p4031_p10 = scmp.ne.s32.totalorder %s4030_s4, 0  ;;  %s2087_s12 = scalar_lea.sflag [#allocation4], %s2086_s17 }
 0x713   : > { %p2571_p3 = pnand %p4032_p5, %p4031_p10 }
 0x715   : > { %p2572_p4 = pneg %p2571_p3 }
 0x717   : > { %3109 = dma.done.wait (%p2572_p4), %s2087_s12, 256  }
 0x718   : > { %3111 = vsyncadd (%p2572_p4), %s2087_s12, 4294967040  ;;  %s4033_s24 = sld [smem:[#allocation23_spill]]  ;;  %s4036_s21 = smov %s3118_s22 }
 0x719   : > { %s4034_s19 = sld [smem:[#allocation21_spill]] }
 0x71a   : > { %s4035_s23 = sld [smem:[#allocation25_spill]] }
 0x71e   : > { %p30_p13 = scmp.ge.s32.totalorder %s4033_s24, 4  }
 0x71f   : > { %s4037_s22 = smov %s4034_s19 }
 0x720   :  { %32 = sbr.rel (!%p30_p13) target bundleno = 17 (0x11), region = 174 }
 0x725   :  { %2092 = vsyncpa [#allocation3], 1 }
 0x726   :  { %2094 = vsyncpa [#allocation3 + $0x1], 1 }
 0x727   :  { %2095 = vsyncpa [#allocation6], 1 }
 0x728   :  { %2097 = vsyncpa [#allocation6 + $0x1], 1 }
 0x729   :  { %2098 = vsyncpa [#allocation9], 1 }
 0x72a   :  { %2099 = vsyncpa [#allocation12], 1 }
 0x72b   :  { %2100 = vsyncpa [#allocation4], 1 }
 0x72c   :  { %2102 = vsyncpa [#allocation4 + $0x1], 1 }

</bundles_post_ra>
